<compile_context>
chip_gen: v5e
topology: v5e:2x2
jax: 0.10.0
libtpu: 0.0.40
codegen_flags: <defaults>
</compile_context>

<pallas_src>
import functools
import math

import jax
import jax.numpy as jnp
from jax.experimental import pallas as pl
from jax.experimental.pallas import tpu as pltpu

EPS = 1e-5
LANE = 128
_MIB = 1024 * 1024


def _round_up(v, m):
    return (v + m - 1) // m * m


def _pad2(a, rows, cols):
    r, c = a.shape
    if r == rows and c == cols:
        return a
    return jnp.pad(a, ((0, rows - r), (0, cols - c)))


def _vmem_budget():
    """Usable VMEM bytes for this chip generation (headroom for compiler scratch)."""
    try:
        cap = int(pltpu.get_tpu_info().vmem_capacity_bytes)
    except Exception:
        cap = 64 * _MIB          # conservative fallback (v7x per-core VMEM)
    return int(cap * 0.8)         # ~102 MiB on v5e/v6e, ~51 MiB on v7x


def _bf16_dot(h_f32, w_bf16):
    # bf16 operands, f32 accumulation on the MXU.
    return jnp.dot(h_f32.astype(jnp.bfloat16), w_bf16,
                   preferred_element_type=jnp.float32)


# --------------------------------------------------------------------------
# Chained (batch-tiled) path: per-layer pallas_calls with streamed row tiles.
# --------------------------------------------------------------------------

def _accumulate_stats(stats_ref, m, tile_idx, tile_n, n_valid, mask_last):
    """Accumulate [sum; sum_sq] of the bias-free pre-activations.

    Single fused += into the (2, hp) accumulator.  The row-validity mask only
    runs on the last grid step (the only tile that can hold padding rows).
    """
    def _update(vals):
        s = jnp.sum(vals, axis=0, keepdims=True)
        q = jnp.sum(vals * vals, axis=0, keepdims=True)
        stats_ref[...] += jnp.concatenate([s, q], axis=0)

    if mask_last:
        last = pl.num_programs(0) - 1

        @pl.when(tile_idx < last)
        def _():
            _update(m)

        @pl.when(tile_idx == last)
        def _():
            row = tile_idx * tile_n + jax.lax.broadcasted_iota(
                jnp.int32, m.shape, 0)
            _update(jnp.where(row < n_valid, m, 0.0))
    else:
        _update(m)


def _finalize_stats(stats_ref, b_ref, n_valid):
    """(sum, sum_sq) of bias-free pre-activation -> (mu, 1/sqrt(var+eps)).

    Variance is shift-invariant, so accumulating before the bias add and
    adding the bias back to mu here is a free shifted one-pass variance.
    """
    inv_n = 1.0 / float(n_valid)
    mu_m = stats_ref[0:1, :] * inv_n
    var = stats_ref[1:2, :] * inv_n - mu_m * mu_m
    mu = mu_m + b_ref[...]
    inv_std = jax.lax.rsqrt(jnp.maximum(var, 0.0) + EPS)
    stats_ref[...] = jnp.concatenate([mu, inv_std], axis=0)


def _input_layer_kernel(x_ref, dv_ref, w_ref, b_ref,
                        zpre_ref, stats_ref, *, n_valid, tile_n, mask_last):
    t = pl.program_id(0)

    @pl.when(t == 0)
    def _():
        stats_ref[...] = jnp.zeros_like(stats_ref)

    h = x_ref[...] * dv_ref[...]
    m = _bf16_dot(h, w_ref[...])                       # bias-free pre-activation
    zpre_ref[...] = (m + b_ref[...]).astype(zpre_ref.dtype)
    _accumulate_stats(stats_ref, m, t, tile_n, n_valid, mask_last)

    @pl.when(t == pl.num_programs(0) - 1)
    def _():
        _finalize_stats(stats_ref, b_ref, n_valid)


def _hidden_layer_kernel(zpre_ref, stats_ref, scale_ref, bias_ref,
                         w_ref, b_ref,
                         z_ref, zpre_next_ref, stats_next_ref,
                         *, n_valid, tile_n, mask_last):
    t = pl.program_id(0)

    @pl.when(t == 0)
    def _():
        stats_next_ref[...] = jnp.zeros_like(stats_next_ref)

    mu = stats_ref[0:1, :]
    inv_std = stats_ref[1:2, :]
    z = (zpre_ref[...].astype(jnp.float32) - mu) * inv_std    # BatchNorm (f32)
    z_ref[...] = z
    h = jnp.maximum(scale_ref[...] * z + bias_ref[...], 0.0)
    m = _bf16_dot(h, w_ref[...])                              # next layer matmul
    zpre_next_ref[...] = (m + b_ref[...]).astype(zpre_next_ref.dtype)
    _accumulate_stats(stats_next_ref, m, t, tile_n, n_valid, mask_last)

    @pl.when(t == pl.num_programs(0) - 1)
    def _():
        _finalize_stats(stats_next_ref, b_ref, n_valid)


def _output_layer_kernel(zpre_ref, stats_ref, scale_ref, bias_ref,
                         w_out_ref, b_out_ref,
                         z_ref, h_ref, y_ref):
    mu = stats_ref[0:1, :]
    inv_std = stats_ref[1:2, :]
    z = (zpre_ref[...].astype(jnp.float32) - mu) * inv_std
    z_ref[...] = z
    h = jnp.maximum(scale_ref[...] * z + bias_ref[...], 0.0)
    h_ref[...] = h
    y_ref[...] = _bf16_dot(h, w_out_ref[...]) + b_out_ref[...]


# --------------------------------------------------------------------------
# Fully-fused single-call path for small problems.
# --------------------------------------------------------------------------

def _fused_kernel(*refs, num_layers, n_valid, rows):
    x_ref, dv_ref = refs[0], refs[1]
    layer_refs = [refs[2 + 4 * i: 2 + 4 * (i + 1)] for i in range(num_layers)]
    w_out_ref, b_out_ref = refs[2 + 4 * num_layers], refs[3 + 4 * num_layers]
    out0 = 4 + 4 * num_layers
    z_refs = refs[out0: out0 + num_layers]
    h_ref, y_ref = refs[out0 + num_layers], refs[out0 + num_layers + 1]

    mask_rows = rows != n_valid
    if mask_rows:
        valid = jax.lax.broadcasted_iota(jnp.int32, (rows, 1), 0) < n_valid
    inv_n = 1.0 / float(n_valid)

    h = x_ref[...] * dv_ref[...]
    for i in range(num_layers):
        w_ref, b_ref, s_ref, g_ref = layer_refs[i]
        z_pre = _bf16_dot(h, w_ref[...]) + b_ref[...]
        zp = jnp.where(valid, z_pre, 0.0) if mask_rows else z_pre
        mu = jnp.sum(zp, axis=0, keepdims=True) * inv_n       # two-pass BN
        d = z_pre - mu
        dm = jnp.where(valid, d, 0.0) if mask_rows else d
        var = jnp.sum(dm * dm, axis=0, keepdims=True) * inv_n
        z = d * jax.lax.rsqrt(var + EPS)
        z_refs[i][...] = z
        h = jnp.maximum(s_ref[...] * z + g_ref[...], 0.0)
    h_ref[...] = h
    y_ref[...] = _bf16_dot(h, w_out_ref[...]) + b_out_ref[...]


# --------------------------------------------------------------------------
# Footprint estimates & wrappers.
# --------------------------------------------------------------------------

def _fused_footprint(rows, ip, hp, op, num_layers):
    f4, b2 = 4, 2
    w = ip * hp * b2 + (num_layers - 1) * hp * hp * b2 + hp * op * b2
    vecs = num_layers * 3 * 8 * hp * f4 + 8 * op * f4     # (1,hp) pads to 8 sublanes
    io = rows * (2 * ip + (num_layers + 1) * hp + op) * f4
    tmp = 4 * rows * hp * f4                              # kernel temporaries headroom
    return w + vecs + io + tmp


def _chain_footprints(t, ip, hp, op, zb):
    """Per-call VMEM estimates.  Resident weights counted 2x (the pipeliner may
    double-buffer constant-index full-array inputs); streamed row tiles 2x
    (double-buffered)."""
    f4, b2 = 4, 2
    small = 4 * 8 * hp * f4 + 8 * op * f4
    f_in = 2 * ip * hp * b2 + small + 2 * t * (2 * ip * f4 + hp * zb)
    f_hid = 2 * hp * hp * b2 + small + 2 * t * (2 * hp * zb + hp * f4)
    f_out = 2 * hp * op * b2 + small + 2 * t * (hp * zb + 2 * hp * f4 + op * f4)
    return f_in, f_hid, f_out


def prepare_params(params, num_layers):
    """One-time lane padding + bf16 weight cast, hoisted out of the forward."""
    input_dim = params['w'][0].shape[0]
    hidden = params['w'][0].shape[1]
    out_dim = params['w_out'].shape[1]
    ip, hp, op = (_round_up(d, LANE) for d in (input_dim, hidden, out_dim))
    f32, bf16 = jnp.float32, jnp.bfloat16
    return {
        'dims': (input_dim, hidden, out_dim, ip, hp, op),
        'w_bf': [_pad2(w, ip if i == 0 else hp, hp).astype(bf16)
                 for i, w in enumerate(params['w'])],
        'b': [_pad2(b.astype(f32), 1, hp) for b in params['b']],
        'scale': [_pad2(s.astype(f32), 1, hp) for s in params['scale']],
        'bias': [_pad2(g.astype(f32), 1, hp) for g in params['bias']],
        'w_out_bf': _pad2(params['w_out'], hp, op).astype(bf16),
        'b_out': _pad2(params['b_out'].astype(f32), 1, op),
    }


def _forward_fused(x, drop_vec, params, num_layers, budget):
    _, hidden, out_dim, ip, hp, op = params['dims']
    N = x.shape[0]
    f32 = jnp.float32
    rows = _round_up(N, 8)

    xp = _pad2(x.astype(f32), rows, ip)
    dvp = _pad2(drop_vec.astype(f32), rows, ip)

    inputs = [xp, dvp]
    for i in range(num_layers):
        inputs += [params['w_bf'][i], params['b'][i],
                   params['scale'][i], params['bias'][i]]
    inputs += [params['w_out_bf'], params['b_out']]

    out_shape = tuple([jax.ShapeDtypeStruct((rows, hp), f32)] * num_layers
                      + [jax.ShapeDtypeStruct((rows, hp), f32),
                         jax.ShapeDtypeStruct((rows, op), f32)])

    kernel = functools.partial(_fused_kernel, num_layers=num_layers,
                               n_valid=N, rows=rows)
    vmem = int(min(max(2 * _fused_footprint(rows, ip, hp, op, num_layers),
                       16 * _MIB), budget))
    outs = pl.pallas_call(
        kernel, out_shape=out_shape,
        compiler_params=pltpu.CompilerParams(vmem_limit_bytes=vmem),
    )(*inputs)

    z_padded = outs[:num_layers]
    h = outs[num_layers][:N, :hidden]
    y = outs[num_layers + 1][:N, :out_dim]
    z_out = [x] + [z[:N, :hidden] for z in z_padded]
    return y, h, z_out


def _forward_chained(x, drop_vec, params, num_layers, budget, *,
                     max_tile_n, zpre_dtype):
    _, hidden, out_dim, ip, hp, op = params['dims']
    N = x.shape[0]
    f32 = jnp.float32
    zb = jnp.dtype(zpre_dtype).itemsize

    # Largest batch tile whose worst-case per-call footprint fits the budget
    # (512-1024 rows ~ HBM roofline; 128 only ~30%).  Multiples of 16 keep the
    # bf16 z_pre tiles sublane-legal.
    cands = [c for c in (1024, 768, 512, 384, 256, 192, 128, 96, 64, 48, 32, 16)
             if c <= max(max_tile_n, 16)]
    tile_n = cands[-1]
    for c in cands:
        if max(_chain_footprints(c, ip, hp, op, zb)) <= budget:
            tile_n = c
            break
    tile_n = min(tile_n, _round_up(N, 16))
    np_ = _round_up(N, tile_n)
    num_tiles = np_ // tile_n
    mask_last = (np_ != N)

    f_in, f_hid, f_out = _chain_footprints(tile_n, ip, hp, op, zb)

    def _lim(f):
        return int(min(max(int(1.3 * f), 16 * _MIB), budget))

    xp = _pad2(x.astype(f32), np_, ip)
    dvp = _pad2(drop_vec.astype(f32), np_, ip)
    # TODO(synk): pass drop_vec as an int8 keep-mask + scalar 1/(1-p) to cut the
    # second f32 input stream when the caller can guarantee that form.

    row_in = pl.BlockSpec((tile_n, ip), lambda t: (t, 0))
    row_h = pl.BlockSpec((tile_n, hp), lambda t: (t, 0))
    row_o = pl.BlockSpec((tile_n, op), lambda t: (t, 0))

    def full(shape):
        # TODO(synk): pipeline_mode=pl.Buffered(1) would single-buffer these
        # constant-index resident blocks; the footprint counts them 2x instead.
        return pl.BlockSpec(shape, lambda t: (0, 0))

    # ---- input layer: h0 = drop_vec * x ; z_pre_0 ; stats_0 -----------------
    kernel0 = functools.partial(_input_layer_kernel, n_valid=N, tile_n=tile_n,
                                mask_last=mask_last)
    z_pre, stats = pl.pallas_call(
        kernel0,
        grid=(num_tiles,),
        in_specs=[row_in, row_in, full((ip, hp)), full((1, hp))],
        out_specs=(row_h, full((2, hp))),
        out_shape=(jax.ShapeDtypeStruct((np_, hp), zpre_dtype),
                   jax.ShapeDtypeStruct((2, hp), f32)),
        compiler_params=pltpu.CompilerParams(
            dimension_semantics=("arbitrary",), vmem_limit_bytes=_lim(f_in)),
    )(xp, dvp, params['w_bf'][0], params['b'][0])
    # TODO(synk): on v7x, split the accumulating calls over both TensorCores
    # (grid (2, num_tiles//2), per-core partial stats combined in the consumer).

    z_padded = []
    # ---- hidden layers j: normalize layer j, relu, matmul of layer j+1 ------
    for j in range(num_layers - 1):
        kernelj = functools.partial(_hidden_layer_kernel, n_valid=N,
                                    tile_n=tile_n, mask_last=mask_last)
        z_j, z_pre, stats = pl.pallas_call(
            kernelj,
            grid=(num_tiles,),
            in_specs=[row_h, full((2, hp)), full((1, hp)), full((1, hp)),
                      full((hp, hp)), full((1, hp))],
            out_specs=(row_h, row_h, full((2, hp))),
            out_shape=(jax.ShapeDtypeStruct((np_, hp), f32),
                       jax.ShapeDtypeStruct((np_, hp), zpre_dtype),
                       jax.ShapeDtypeStruct((2, hp), f32)),
            compiler_params=pltpu.CompilerParams(
                dimension_semantics=("arbitrary",),
                vmem_limit_bytes=_lim(f_hid)),
        )(z_pre, stats, params['scale'][j], params['bias'][j],
          params['w_bf'][j + 1], params['b'][j + 1])
        z_padded.append(z_j)

    # ---- output layer: normalize layer L-1, h, y = h @ W_out + b_out --------
    z_last, h, y = pl.pallas_call(
        _output_layer_kernel,
        grid=(num_tiles,),
        in_specs=[row_h, full((2, hp)), full((1, hp)), full((1, hp)),
                  full((hp, op)), full((1, op))],
        out_specs=(row_h, row_h, row_o),
        out_shape=(jax.ShapeDtypeStruct((np_, hp), f32),
                   jax.ShapeDtypeStruct((np_, hp), f32),
                   jax.ShapeDtypeStruct((np_, op), f32)),
        compiler_params=pltpu.CompilerParams(
            dimension_semantics=("parallel",), vmem_limit_bytes=_lim(f_out)),
    )(z_pre, stats, params['scale'][num_layers - 1],
      params['bias'][num_layers - 1], params['w_out_bf'], params['b_out'])
    z_padded.append(z_last)

    y = y[:N, :out_dim]
    h = h[:N, :hidden]
    z_out = [x] + [z[:N, :hidden] for z in z_padded]
    return y, h, z_out


def hld_forward(x, drop_vec, params, num_layers, *, max_tile_n=1024,
                force_chain=False, zpre_dtype=jnp.bfloat16):
    """HLD forward pass.  Dispatches between a fully-fused single pallas_call
    (small problems: everything resident in VMEM) and a chain of
    (num_layers + 1) batch-tiled pallas_calls (large problems), each fusing
    "normalize layer i + scale/bias/ReLU + matmul of layer i+1" and
    accumulating the next layer's BatchNorm statistics on the fly.

    Returns (y, h, z_out) matching the PyTorch module (z_out[0] == x).
    """
    assert num_layers >= 1
    if 'w_bf' not in params:                 # accept raw (unprepared) params too
        params = prepare_params(params, num_layers)
    _, _, _, ip, hp, op = params['dims']
    N = x.shape[0]
    budget = _vmem_budget()

    rows8 = _round_up(N, 8)
    if (not force_chain
            and _fused_footprint(rows8, ip, hp, op, num_layers) <= budget // 2):
        return _forward_fused(x, drop_vec, params, num_layers, budget)
    return _forward_chained(x, drop_vec, params, num_layers, budget,
                            max_tile_n=max_tile_n, zpre_dtype=zpre_dtype)


# --------------------------------------------------------------------------
# Parameter init & pure-JAX reference.
# --------------------------------------------------------------------------

def init_params(key, input_dim, hidden_dim, num_layers, output_dim):
    """Deterministic parameter init (torch nn.Linear-style uniform bounds)."""
    params = {'w': [], 'b': [], 'scale': [], 'bias': []}
    dims_in = [input_dim] + [hidden_dim] * (num_layers - 1)
    for i in range(num_layers):
        key, k1, k2 = jax.random.split(key, 3)
        bound = 1.0 / math.sqrt(dims_in[i])
        params['w'].append(jax.random.uniform(
            k1, (dims_in[i], hidden_dim), jnp.float32, -bound, bound))
        params['b'].append(jax.random.uniform(
            k2, (1, hidden_dim), jnp.float32, -bound, bound))
        params['scale'].append(jnp.ones((1, hidden_dim), jnp.float32))
        params['bias'].append(jnp.zeros((1, hidden_dim), jnp.float32))
    key, k1, k2 = jax.random.split(key, 3)
    bound = 1.0 / math.sqrt(hidden_dim)
    params['w_out'] = jax.random.uniform(
        k1, (hidden_dim, output_dim), jnp.float32, -bound, bound)
    params['b_out'] = jax.random.uniform(
        k2, (1, output_dim), jnp.float32, -bound, bound)
    return params


def _ref_dot(h, w):
    # Same numerics as the kernels: bf16 operands, f32 accumulation.
    return jnp.dot(h.astype(jnp.bfloat16), w.astype(jnp.bfloat16),
                   preferred_element_type=jnp.float32)


def reference_forward(x, drop_vec, params, num_layers):
    """Pure-JAX reference matching the PyTorch semantics (bf16 matmuls)."""
    z = x
    z_out = [z]
    h = drop_vec * z
    for i in range(num_layers):
        z_pre = _ref_dot(h, params['w'][i]) + params['b'][i]
        mu = jnp.mean(z_pre, axis=0, keepdims=True)
        var = jnp.mean((z_pre - mu) ** 2, axis=0, keepdims=True)
        z = (z_pre - mu) * jax.lax.rsqrt(var + EPS)
        z_out.append(z)
        h = jnp.maximum(params['scale'][i] * z + params['bias'][i], 0.0)
    y = _ref_dot(h, params['w_out']) + params['b_out']
    return y, h, z_out


if __name__ == "__main__":
    # Small shapes consistent with the module's (N, in) => (N, hidden)^L => (N, out).
    # N is deliberately NOT a multiple of the batch tile used by the forced
    # chained call below, so the masked-statistics path is exercised.
    N, input_dim, hidden_dim, num_layers, output_dim = 200, 64, 96, 3, 8
    dropout_p = 0.1

    key = jax.random.PRNGKey(0)
    key, kx, kd, kp = jax.random.split(key, 4)

    x = jax.random.normal(kx, (N, input_dim), dtype=jnp.float32)

    # drop_vec = nn.Dropout(p)(ones_like(x)) in training mode (inverted dropout).
    # TODO(synk): when drop_vec is None the module generates it internally; that
    # path could move in-kernel via pltpu.prng_seed/prng_random_bits to save the
    # (N, input_dim) HBM read, at the cost of a non-reproducible-vs-torch RNG.
    keep = jax.random.bernoulli(kd, 1.0 - dropout_p, (N, input_dim))
    drop_vec = keep.astype(jnp.float32) / (1.0 - dropout_p)

    params = init_params(kp, input_dim, hidden_dim, num_layers, output_dim)
    prepared = prepare_params(params, num_layers)   # one-time pad + bf16 cast

    y_ref, h_ref, z_ref = reference_forward(x, drop_vec, params, num_layers)

    def _check(a, b, name, tol):
        err = float(jnp.max(jnp.abs(a - b)))
        assert err < tol, f"{name} mismatch: max abs err {err}"

    # 1) Small problem -> fully-fused single-call path.
    y, h, z_out = hld_forward(x, drop_vec, prepared, num_layers)
    jax.block_until_ready(y)
    jax.block_until_ready(h)
    for z in z_out:
        jax.block_until_ready(z)
    _check(y, y_ref, "fused y", 5e-3)
    _check(h, h_ref, "fused h", 5e-3)
    for li, (a, b) in enumerate(zip(z_out, z_ref)):
        _check(a, b, f"fused z_out[{li}]", 5e-3)

    # 2) Force the batch-tiled layer-chain path (bf16 inter-layer z_pre stream)
    #    with a small tile so multi-tile stats accumulation and last-tile row
    #    masking are exercised.  Looser tolerance accounts for the bf16
    #    quantization of the streamed pre-activations.
    y2, h2, z2 = hld_forward(x, drop_vec, prepared, num_layers,
                             force_chain=True, max_tile_n=64)
    jax.block_until_ready(y2)
    _check(y2, y_ref, "chained y", 1e-1)
    _check(h2, h_ref, "chained h", 1e-1)
    for li, (a, b) in enumerate(zip(z2, z_ref)):
        _check(a, b, f"chained z_out[{li}]", 1e-1)

    print("KERNEL_OK")
</pallas_src>

<mosaic_0001>
module attributes {stable_mosaic.version = 11 : i64} {
  func.func @_fused_kernel(%arg0: memref<200x128xf32, #tpu.memory_space<vmem>>, %arg1: memref<200x128xf32, #tpu.memory_space<vmem>>, %arg2: memref<128x128xbf16, #tpu.memory_space<vmem>>, %arg3: memref<1x128xf32, #tpu.memory_space<vmem>>, %arg4: memref<1x128xf32, #tpu.memory_space<vmem>>, %arg5: memref<1x128xf32, #tpu.memory_space<vmem>>, %arg6: memref<128x128xbf16, #tpu.memory_space<vmem>>, %arg7: memref<1x128xf32, #tpu.memory_space<vmem>>, %arg8: memref<1x128xf32, #tpu.memory_space<vmem>>, %arg9: memref<1x128xf32, #tpu.memory_space<vmem>>, %arg10: memref<128x128xbf16, #tpu.memory_space<vmem>>, %arg11: memref<1x128xf32, #tpu.memory_space<vmem>>, %arg12: memref<1x128xf32, #tpu.memory_space<vmem>>, %arg13: memref<1x128xf32, #tpu.memory_space<vmem>>, %arg14: memref<128x128xbf16, #tpu.memory_space<vmem>>, %arg15: memref<1x128xf32, #tpu.memory_space<vmem>>, %arg16: memref<200x128xf32, #tpu.memory_space<vmem>>, %arg17: memref<200x128xf32, #tpu.memory_space<vmem>>, %arg18: memref<200x128xf32, #tpu.memory_space<vmem>>, %arg19: memref<200x128xf32, #tpu.memory_space<vmem>>, %arg20: memref<200x128xf32, #tpu.memory_space<vmem>>) attributes {dimension_semantics = [], scalar_prefetch = 0 : i64, scratch_operands = 0 : i64, tpu.core_type = #tpu.core_type<tc>} {
    %c0 = arith.constant 0 : index
    %c0_0 = arith.constant 0 : index
    %0 = vector.load %arg0[%c0, %c0_0] : memref<200x128xf32, #tpu.memory_space<vmem>>, vector<200x128xf32>
    %c0_1 = arith.constant 0 : index
    %c0_2 = arith.constant 0 : index
    %1 = vector.load %arg1[%c0_1, %c0_2] : memref<200x128xf32, #tpu.memory_space<vmem>>, vector<200x128xf32>
    %2 = arith.mulf %0, %1 : vector<200x128xf32>
    %c0_3 = arith.constant 0 : index
    %c0_4 = arith.constant 0 : index
    %3 = vector.load %arg2[%c0_3, %c0_4] : memref<128x128xbf16, #tpu.memory_space<vmem>>, vector<128x128xbf16>
    %4 = arith.truncf %2 : vector<200x128xf32> to vector<200x128xbf16>
    %cst = arith.constant dense<0.000000e+00> : vector<200x128xf32>
    %5 = tpu.matmul %4, %3, %cst {dimension_numbers = #tpu.dot_dimension_numbers<[1], [0], [0], [1], [0, 0, 1, 1], [], []>} : vector<200x128xbf16>, vector<128x128xbf16>, vector<200x128xf32> -> vector<200x128xf32>
    %c0_5 = arith.constant 0 : index
    %c0_6 = arith.constant 0 : index
    %6 = vector.load %arg3[%c0_5, %c0_6] : memref<1x128xf32, #tpu.memory_space<vmem>>, vector<1x128xf32>
    %7 = vector.broadcast %6 : vector<1x128xf32> to vector<200x128xf32>
    %8 = arith.addf %5, %7 : vector<200x128xf32>
    %cst_7 = arith.constant dense<0.000000e+00> : vector<128xf32>
    %9 = vector.multi_reduction <add>, %8, %cst_7 [0] : vector<200x128xf32> to vector<128xf32>
    %10 = vector.shape_cast %9 : vector<128xf32> to vector<1x128xf32>
    %cst_8 = arith.constant 5.000000e-03 : f32
    %11 = vector.broadcast %cst_8 : f32 to vector<1x128xf32>
    %12 = arith.mulf %10, %11 : vector<1x128xf32>
    %13 = vector.broadcast %12 : vector<1x128xf32> to vector<200x128xf32>
    %14 = arith.subf %8, %13 : vector<200x128xf32>
    %15 = arith.mulf %14, %14 : vector<200x128xf32>
    %cst_9 = arith.constant dense<0.000000e+00> : vector<128xf32>
    %16 = vector.multi_reduction <add>, %15, %cst_9 [0] : vector<200x128xf32> to vector<128xf32>
    %17 = vector.shape_cast %16 : vector<128xf32> to vector<1x128xf32>
    %cst_10 = arith.constant 5.000000e-03 : f32
    %18 = vector.broadcast %cst_10 : f32 to vector<1x128xf32>
    %19 = arith.mulf %17, %18 : vector<1x128xf32>
    %cst_11 = arith.constant 9.99999974E-6 : f32
    %20 = vector.broadcast %cst_11 : f32 to vector<1x128xf32>
    %21 = arith.addf %19, %20 : vector<1x128xf32>
    %22 = math.rsqrt %21 : vector<1x128xf32>
    %23 = vector.broadcast %22 : vector<1x128xf32> to vector<200x128xf32>
    %24 = arith.mulf %14, %23 : vector<200x128xf32>
    %c0_12 = arith.constant 0 : index
    %c0_13 = arith.constant 0 : index
    %25 = vector.load %arg16[%c0_12, %c0_13] : memref<200x128xf32, #tpu.memory_space<vmem>>, vector<200x128xf32>
    tpu.vector_store %arg16[%c0_12, %c0_13], %24 {strides = array<i32>} : memref<200x128xf32, #tpu.memory_space<vmem>>, vector<200x128xf32>,
    %c0_14 = arith.constant 0 : index
    %c0_15 = arith.constant 0 : index
    %26 = vector.load %arg4[%c0_14, %c0_15] : memref<1x128xf32, #tpu.memory_space<vmem>>, vector<1x128xf32>
    %27 = vector.broadcast %26 : vector<1x128xf32> to vector<200x128xf32>
    %28 = arith.mulf %27, %24 : vector<200x128xf32>
    %c0_16 = arith.constant 0 : index
    %c0_17 = arith.constant 0 : index
    %29 = vector.load %arg5[%c0_16, %c0_17] : memref<1x128xf32, #tpu.memory_space<vmem>>, vector<1x128xf32>
    %30 = vector.broadcast %29 : vector<1x128xf32> to vector<200x128xf32>
    %31 = arith.addf %28, %30 : vector<200x128xf32>
    %cst_18 = arith.constant 0.000000e+00 : f32
    %32 = vector.broadcast %cst_18 : f32 to vector<200x128xf32>
    %33 = arith.maximumf %31, %32 : vector<200x128xf32>
    %c0_19 = arith.constant 0 : index
    %c0_20 = arith.constant 0 : index
    %34 = vector.load %arg6[%c0_19, %c0_20] : memref<128x128xbf16, #tpu.memory_space<vmem>>, vector<128x128xbf16>
    %35 = arith.truncf %33 : vector<200x128xf32> to vector<200x128xbf16>
    %cst_21 = arith.constant dense<0.000000e+00> : vector<200x128xf32>
    %36 = tpu.matmul %35, %34, %cst_21 {dimension_numbers = #tpu.dot_dimension_numbers<[1], [0], [0], [1], [0, 0, 1, 1], [], []>} : vector<200x128xbf16>, vector<128x128xbf16>, vector<200x128xf32> -> vector<200x128xf32>
    %c0_22 = arith.constant 0 : index
    %c0_23 = arith.constant 0 : index
    %37 = vector.load %arg7[%c0_22, %c0_23] : memref<1x128xf32, #tpu.memory_space<vmem>>, vector<1x128xf32>
    %38 = vector.broadcast %37 : vector<1x128xf32> to vector<200x128xf32>
    %39 = arith.addf %36, %38 : vector<200x128xf32>
    %cst_24 = arith.constant dense<0.000000e+00> : vector<128xf32>
    %40 = vector.multi_reduction <add>, %39, %cst_24 [0] : vector<200x128xf32> to vector<128xf32>
    %41 = vector.shape_cast %40 : vector<128xf32> to vector<1x128xf32>
    %cst_25 = arith.constant 5.000000e-03 : f32
    %42 = vector.broadcast %cst_25 : f32 to vector<1x128xf32>
    %43 = arith.mulf %41, %42 : vector<1x128xf32>
    %44 = vector.broadcast %43 : vector<1x128xf32> to vector<200x128xf32>
    %45 = arith.subf %39, %44 : vector<200x128xf32>
    %46 = arith.mulf %45, %45 : vector<200x128xf32>
    %cst_26 = arith.constant dense<0.000000e+00> : vector<128xf32>
    %47 = vector.multi_reduction <add>, %46, %cst_26 [0] : vector<200x128xf32> to vector<128xf32>
    %48 = vector.shape_cast %47 : vector<128xf32> to vector<1x128xf32>
    %cst_27 = arith.constant 5.000000e-03 : f32
    %49 = vector.broadcast %cst_27 : f32 to vector<1x128xf32>
    %50 = arith.mulf %48, %49 : vector<1x128xf32>
    %cst_28 = arith.constant 9.99999974E-6 : f32
    %51 = vector.broadcast %cst_28 : f32 to vector<1x128xf32>
    %52 = arith.addf %50, %51 : vector<1x128xf32>
    %53 = math.rsqrt %52 : vector<1x128xf32>
    %54 = vector.broadcast %53 : vector<1x128xf32> to vector<200x128xf32>
    %55 = arith.mulf %45, %54 : vector<200x128xf32>
    %c0_29 = arith.constant 0 : index
    %c0_30 = arith.constant 0 : index
    %56 = vector.load %arg17[%c0_29, %c0_30] : memref<200x128xf32, #tpu.memory_space<vmem>>, vector<200x128xf32>
    tpu.vector_store %arg17[%c0_29, %c0_30], %55 {strides = array<i32>} : memref<200x128xf32, #tpu.memory_space<vmem>>, vector<200x128xf32>,
    %c0_31 = arith.constant 0 : index
    %c0_32 = arith.constant 0 : index
    %57 = vector.load %arg8[%c0_31, %c0_32] : memref<1x128xf32, #tpu.memory_space<vmem>>, vector<1x128xf32>
    %58 = vector.broadcast %57 : vector<1x128xf32> to vector<200x128xf32>
    %59 = arith.mulf %58, %55 : vector<200x128xf32>
    %c0_33 = arith.constant 0 : index
    %c0_34 = arith.constant 0 : index
    %60 = vector.load %arg9[%c0_33, %c0_34] : memref<1x128xf32, #tpu.memory_space<vmem>>, vector<1x128xf32>
    %61 = vector.broadcast %60 : vector<1x128xf32> to vector<200x128xf32>
    %62 = arith.addf %59, %61 : vector<200x128xf32>
    %cst_35 = arith.constant 0.000000e+00 : f32
    %63 = vector.broadcast %cst_35 : f32 to vector<200x128xf32>
    %64 = arith.maximumf %62, %63 : vector<200x128xf32>
    %c0_36 = arith.constant 0 : index
    %c0_37 = arith.constant 0 : index
    %65 = vector.load %arg10[%c0_36, %c0_37] : memref<128x128xbf16, #tpu.memory_space<vmem>>, vector<128x128xbf16>
    %66 = arith.truncf %64 : vector<200x128xf32> to vector<200x128xbf16>
    %cst_38 = arith.constant dense<0.000000e+00> : vector<200x128xf32>
    %67 = tpu.matmul %66, %65, %cst_38 {dimension_numbers = #tpu.dot_dimension_numbers<[1], [0], [0], [1], [0, 0, 1, 1], [], []>} : vector<200x128xbf16>, vector<128x128xbf16>, vector<200x128xf32> -> vector<200x128xf32>
    %c0_39 = arith.constant 0 : index
    %c0_40 = arith.constant 0 : index
    %68 = vector.load %arg11[%c0_39, %c0_40] : memref<1x128xf32, #tpu.memory_space<vmem>>, vector<1x128xf32>
    %69 = vector.broadcast %68 : vector<1x128xf32> to vector<200x128xf32>
    %70 = arith.addf %67, %69 : vector<200x128xf32>
    %cst_41 = arith.constant dense<0.000000e+00> : vector<128xf32>
    %71 = vector.multi_reduction <add>, %70, %cst_41 [0] : vector<200x128xf32> to vector<128xf32>
    %72 = vector.shape_cast %71 : vector<128xf32> to vector<1x128xf32>
    %cst_42 = arith.constant 5.000000e-03 : f32
    %73 = vector.broadcast %cst_42 : f32 to vector<1x128xf32>
    %74 = arith.mulf %72, %73 : vector<1x128xf32>
    %75 = vector.broadcast %74 : vector<1x128xf32> to vector<200x128xf32>
    %76 = arith.subf %70, %75 : vector<200x128xf32>
    %77 = arith.mulf %76, %76 : vector<200x128xf32>
    %cst_43 = arith.constant dense<0.000000e+00> : vector<128xf32>
    %78 = vector.multi_reduction <add>, %77, %cst_43 [0] : vector<200x128xf32> to vector<128xf32>
    %79 = vector.shape_cast %78 : vector<128xf32> to vector<1x128xf32>
    %cst_44 = arith.constant 5.000000e-03 : f32
    %80 = vector.broadcast %cst_44 : f32 to vector<1x128xf32>
    %81 = arith.mulf %79, %80 : vector<1x128xf32>
    %cst_45 = arith.constant 9.99999974E-6 : f32
    %82 = vector.broadcast %cst_45 : f32 to vector<1x128xf32>
    %83 = arith.addf %81, %82 : vector<1x128xf32>
    %84 = math.rsqrt %83 : vector<1x128xf32>
    %85 = vector.broadcast %84 : vector<1x128xf32> to vector<200x128xf32>
    %86 = arith.mulf %76, %85 : vector<200x128xf32>
    %c0_46 = arith.constant 0 : index
    %c0_47 = arith.constant 0 : index
    %87 = vector.load %arg18[%c0_46, %c0_47] : memref<200x128xf32, #tpu.memory_space<vmem>>, vector<200x128xf32>
    tpu.vector_store %arg18[%c0_46, %c0_47], %86 {strides = array<i32>} : memref<200x128xf32, #tpu.memory_space<vmem>>, vector<200x128xf32>,
    %c0_48 = arith.constant 0 : index
    %c0_49 = arith.constant 0 : index
    %88 = vector.load %arg12[%c0_48, %c0_49] : memref<1x128xf32, #tpu.memory_space<vmem>>, vector<1x128xf32>
    %89 = vector.broadcast %88 : vector<1x128xf32> to vector<200x128xf32>
    %90 = arith.mulf %89, %86 : vector<200x128xf32>
    %c0_50 = arith.constant 0 : index
    %c0_51 = arith.constant 0 : index
    %91 = vector.load %arg13[%c0_50, %c0_51] : memref<1x128xf32, #tpu.memory_space<vmem>>, vector<1x128xf32>
    %92 = vector.broadcast %91 : vector<1x128xf32> to vector<200x128xf32>
    %93 = arith.addf %90, %92 : vector<200x128xf32>
    %cst_52 = arith.constant 0.000000e+00 : f32
    %94 = vector.broadcast %cst_52 : f32 to vector<200x128xf32>
    %95 = arith.maximumf %93, %94 : vector<200x128xf32>
    %c0_53 = arith.constant 0 : index
    %c0_54 = arith.constant 0 : index
    %96 = vector.load %arg19[%c0_53, %c0_54] : memref<200x128xf32, #tpu.memory_space<vmem>>, vector<200x128xf32>
    tpu.vector_store %arg19[%c0_53, %c0_54], %95 {strides = array<i32>} : memref<200x128xf32, #tpu.memory_space<vmem>>, vector<200x128xf32>,
    %c0_55 = arith.constant 0 : index
    %c0_56 = arith.constant 0 : index
    %97 = vector.load %arg14[%c0_55, %c0_56] : memref<128x128xbf16, #tpu.memory_space<vmem>>, vector<128x128xbf16>
    %98 = arith.truncf %95 : vector<200x128xf32> to vector<200x128xbf16>
    %cst_57 = arith.constant dense<0.000000e+00> : vector<200x128xf32>
    %99 = tpu.matmul %98, %97, %cst_57 {dimension_numbers = #tpu.dot_dimension_numbers<[1], [0], [0], [1], [0, 0, 1, 1], [], []>} : vector<200x128xbf16>, vector<128x128xbf16>, vector<200x128xf32> -> vector<200x128xf32>
    %c0_58 = arith.constant 0 : index
    %c0_59 = arith.constant 0 : index
    %100 = vector.load %arg15[%c0_58, %c0_59] : memref<1x128xf32, #tpu.memory_space<vmem>>, vector<1x128xf32>
    %101 = vector.broadcast %100 : vector<1x128xf32> to vector<200x128xf32>
    %102 = arith.addf %99, %101 : vector<200x128xf32>
    %c0_60 = arith.constant 0 : index
    %c0_61 = arith.constant 0 : index
    %103 = vector.load %arg20[%c0_60, %c0_61] : memref<200x128xf32, #tpu.memory_space<vmem>>, vector<200x128xf32>
    tpu.vector_store %arg20[%c0_60, %c0_61], %102 {strides = array<i32>} : memref<200x128xf32, #tpu.memory_space<vmem>>, vector<200x128xf32>,
    return
  }
}

</mosaic_0001>

<bundles_post_ra>
// kernel: tpu_custom_call.1
= control target key start
LH: loop header
LB: loop body
LE: loop exit
PB: predicated region body
PF: predicated region fallthrough
CT: control target
= control target key end

     0   :  { %s3629_s0 = inlined_call_operand.hbm [shape: f32[200,128], index: 0, kind: input, shape index: {}]   ;;  %s3630_s1 = inlined_call_operand.hbm [shape: f32[200,128], index: 1, kind: input, shape index: {}]   ;;  %s3631_s2 = inlined_call_operand.hbm [shape: bf16[128,128], index: 2, kind: input, shape index: {}]   ;;  %s3632_s3 = inlined_call_operand.vmem [shape: f32[1,128], index: 3, kind: input, shape index: {}]   ;;  %s3633_s4 = inlined_call_operand.vmem [shape: f32[1,128], index: 4, kind: input, shape index: {}]   ;;  %s3634_s5 = inlined_call_operand.vmem [shape: f32[1,128], index: 5, kind: input, shape index: {}]   ;;  %s3635_s6 = inlined_call_operand.hbm [shape: bf16[128,128], index: 6, kind: input, shape index: {}]   ;;  %s3636_s7 = inlined_call_operand.vmem [shape: f32[1,128], index: 7, kind: input, shape index: {}]   ;;  %s3637_s8 = inlined_call_operand.vmem [shape: f32[1,128], index: 8, kind: input, shape index: {}]   ;;  %s3638_s9 = inlined_call_operand.vmem [shape: f32[1,128], index: 9, kind: input, shape index: {}]   ;;  %s3639_s10 = inlined_call_operand.hbm [shape: bf16[128,128], index: 10, kind: input, shape index: {}]   ;;  %s3640_s11 = inlined_call_operand.vmem [shape: f32[1,128], index: 11, kind: input, shape index: {}]   ;;  %s3641_s12 = inlined_call_operand.vmem [shape: f32[1,128], index: 12, kind: input, shape index: {}]   ;;  %s3642_s13 = inlined_call_operand.vmem [shape: f32[1,128], index: 13, kind: input, shape index: {}]   ;;  %s3643_s14 = inlined_call_operand.hbm [shape: bf16[128,128], index: 14, kind: input, shape index: {}]   ;;  %s3644_s15 = inlined_call_operand.vmem [shape: f32[1,128], index: 15, kind: input, shape index: {}]   ;;  %s3645_s16 = inlined_call_operand.hbm [shape: f32[200,128], index: 16, kind: output, shape index: {0}]   ;;  %s3646_s17 = inlined_call_operand.hbm [shape: f32[200,128], index: 17, kind: output, shape index: {1}]   ;;  %s3647_s18 = inlined_call_operand.hbm [shape: f32[200,128], index: 18, kind: output, shape index: {2}]   ;;  %s3648_s19 = inlined_call_operand.hbm [shape: f32[200,128], index: 19, kind: output, shape index: {3}]   ;;  %s3649_s20 = inlined_call_operand.hbm [shape: f32[200,128], index: 20, kind: output, shape index: {4}]  }
   0x1   :  { %3652 = sst [smem:[#allocation27_spill]] %s3629_s0 }
   0x2   :  { %3653 = sst [smem:[#allocation28_spill]] %s3630_s1 }
   0x3   :  { %3654 = sst [smem:[#allocation29_spill]] %s3631_s2 }
   0x4   :  { %3655 = sst [smem:[#allocation30_spill]] %s3632_s3 }
   0x5   :  { %3656 = sst [smem:[#allocation31_spill]] %s3633_s4 }
   0x6   :  { %3657 = sst [smem:[#allocation32_spill]] %s3645_s16 }
   0x7   :  { %3658 = sst [smem:[#allocation33_spill]] %s3647_s18 }
   0x8   :  { %3659 = sst [smem:[#allocation34_spill]] %s3649_s20 }
   0x9   :  { %26 = vsyncpa [#allocation3], 0 }
   0xa   :  { %27 = vsyncpa [#allocation6], 0 }
   0xb   :  { %28 = vsyncpa [#allocation9], 0 }
   0xc   :  { %29 = vsyncpa [#allocation12], 0 }
   0xd   :  { %30 = vsyncpa [#allocation4], 0 }
   0xe   :  { %31 = vsyncpa [#allocation15], 0 }
   0xf   :  { %32 = vsyncpa [#allocation18], 0  ;;  %s3660_s23 = sld [smem:[#allocation28_spill]]  ;;  %s2225_s2 = smov [#allocation5]  }
  0x10   :  { %s52_s25 = sshll.u32 %s2225_s2, 4  ;;  %s3650_s3 = smov 128   ;;  %s53_s25 = int_to_ptr.vmem [resolvable:$true] %s52_s25 }
  0x11   :  { %s2227_s26 = smov 8   ;;  %s82_s4 = sshll.u32 %s3635_s6, 4  ;;  %s83_s4 = int_to_ptr.hbm [resolvable:$true] %s82_s4 }
  0x12   :  { %s2228_s29 = smov [#allocation8]   ;;  %s3661_s1 = sld [smem:[#allocation27_spill]] }
  0x13   :  { %s84_s30 = sshll.u32 %s2228_s29, 4  ;;  %s2230_s2 = smov 4   ;;  %s85_s30 = int_to_ptr.vmem [resolvable:$true] %s84_s30 }
  0x14   :  { %s3662_s16 = sld [smem:[#allocation29_spill]]  ;;  %s3663_s6 = smov 128  }
  0x15   :  { %s50_s24 = sshll.u32 %s3660_s23, 4  ;;  %s2229_s23 = smov 64   ;;  %s51_s24 = int_to_ptr.hbm [resolvable:$true] %s50_s24 }
  0x16   :  { %58 = dma.hbm_to_vmem [thread:$0]  %s51_s24, 3200, %s53_s25, [#allocation6], %s3650_s3, %s3650_s3, %s2227_s26  }
  0x17   :  { %90 = dma.hbm_to_vmem [thread:$0]  %s83_s4, 1024, %s85_s30, [#allocation9], %s2229_s23, %s2229_s23, %s2230_s2  }
  0x18   :  { %s37_s22 = sshll.u32 %s3661_s1, 4  ;;  %s2231_s25 = smov [#allocation2]   ;;  %s38_s22 = int_to_ptr.hbm [resolvable:$true] %s37_s22 }
  0x19   :  { %s39_s3 = sshll.u32 %s2231_s25, 4  ;;  %s2232_s27 = smov [#allocation7]   ;;  %s40_s3 = int_to_ptr.vmem [resolvable:$true] %s39_s3 }
  0x1a   :  { %s63_s24 = sshll.u32 %s3662_s16, 4  ;;  %s65_s28 = sshll.u32 %s2232_s27, 4  ;;  %s64_s24 = int_to_ptr.hbm [resolvable:$true] %s63_s24  ;;  %s66_s28 = int_to_ptr.vmem [resolvable:$true] %s65_s28 }
  0x1b   :  { %45 = dma.hbm_to_vmem [thread:$0]  %s38_s22, 3200, %s40_s3, [#allocation3], %s3663_s6, %s3663_s6, %s2227_s26  }
  0x1c   :  { %s101_s21 = sshll.u32 %s3639_s10, 4  ;;  %s120_s16 = sshll.u32 %s3643_s14, 4  ;;  %s102_s21 = int_to_ptr.hbm [resolvable:$true] %s101_s21  ;;  %s121_s16 = int_to_ptr.hbm [resolvable:$true] %s120_s16 }
  0x1d   :  { %71 = dma.hbm_to_vmem [thread:$0]  %s64_s24, 1024, %s66_s28, [#allocation6], %s2229_s23, %s2229_s23, %s2230_s2  }
  0x1e   :  { %s2233_s20 = smov [#allocation10]   ;;  %s2234_s1 = smov [#allocation11]  }
  0x1f   :  { %s103_s30 = sshll.u32 %s2233_s20, 4  ;;  %s122_s3 = sshll.u32 %s2234_s1, 4  ;;  %s104_s30 = int_to_ptr.vmem [resolvable:$true] %s103_s30  ;;  %s123_s3 = int_to_ptr.vmem [resolvable:$true] %s122_s3 }
  0x20   :  { %109 = dma.hbm_to_vmem [thread:$0]  %s102_s21, 1024, %s104_s30, [#allocation9], %s2229_s23, %s2229_s23, %s2230_s2  }
  0x21   :  { %128 = dma.hbm_to_vmem [thread:$0]  %s121_s16, 1024, %s123_s3, [#allocation12], %s2229_s23, %s2229_s23, %s2230_s2  }
  0x22   :  { %2211 = dma.done.wait [#allocation3], 3200  }
  0x23   :  { %2212 = vsyncadd [#allocation3], 4294964096 }
  0x24   :  { %2213 = dma.done.wait [#allocation6], 4224  }
  0x25   :  { %2214 = vsyncadd [#allocation6], 4294963072 }
  0x26   :  { %2215 = dma.done.wait [#allocation9], 2048  }
  0x27   :  { %2216 = vsyncadd [#allocation9], 4294965248 }
  0x28   :  { %2217 = dma.done.wait [#allocation12], 1024  }
  0x29   :  { %2218 = vsyncadd [#allocation12], 4294966272  ;;  %v1891_v0 = vld [vmem:[#allocation7 + $0x38] sm:$0xff]  ;;  %v1890_v1 = vld [vmem:[#allocation7 + $0x30] sm:$0xff]  ;;  %s3664_s22 = sld [smem:[#allocation30_spill]]  ;;  %s1683_s30 = sshll.u32 %s3646_s17, 4  ;;  %s1684_s30 = int_to_ptr.hbm [resolvable:$true] %s1683_s30 }
  0x2a   :  { %311 = vmatpush.bf16.msra.mxu0 %v1891_v0  ;;  %v1889_v2 = vld [vmem:[#allocation7 + $0x28] sm:$0xff]  ;;  %v1888_v3 = vld [vmem:[#allocation7 + $0x20] sm:$0xff]  ;;  %v1887_v4 = vld [vmem:[#allocation7 + $0x18] sm:$0xff]  ;;  %s3665_s24 = sld [smem:[#allocation31_spill]]  ;;  %s2235_s1 = smov [#allocation14]  }
  0x2b   :  { %v1886_v5 = vld [vmem:[#allocation7 + $0x10] sm:$0xff]  ;;  %v1885_v6 = vld [vmem:[#allocation7 + $0x8] sm:$0xff]  ;;  %v156_v8 = vld [vmem:[#allocation2 + $0x8] sm:$0xff]  ;;  %s1681_s3 = sshll.u32 %s2235_s1, 4  ;;  %s2236_s10 = smov [#allocation17]   ;;  %s1682_s3 = int_to_ptr.vmem [resolvable:$true] %s1681_s3 }
  0x2c   :  { %v155_v7 = vld [vmem:[#allocation2] sm:$0xff]  ;;  %v180_v9 = vld [vmem:[#allocation5] sm:$0xff]  ;;  %v181_v10 = vld [vmem:[#allocation5 + $0x8] sm:$0xff]  ;;  %s1707_s14 = sshll.u32 %s2236_s10, 4  ;;  %s1709_s2 = sshll.u32 %s3648_s19, 4  ;;  %s1708_s14 = int_to_ptr.vmem [resolvable:$true] %s1707_s14  ;;  %s1710_s2 = int_to_ptr.hbm [resolvable:$true] %s1709_s2 }
  0x2d   :  { %v205_v11 = vmul.f32 %v180_v9, %v155_v7  ;;  %v206_v12 = vmul.f32 %v181_v10, %v156_v8  ;;  %v1884_v13 = vld [vmem:[#allocation7] sm:$0xff]  ;;  %v158_v16 = vld [vmem:[#allocation2 + $0x18] sm:$0xff]  ;;  %v183_v18 = vld [vmem:[#allocation5 + $0x18] sm:$0xff]  ;;  %s3666_s25 = sld [smem:[#allocation32_spill]]  ;;  %s2238_s19 = smov [#allocation16]  }
  0x2e   :  { %312 = vmatpush.bf16.msra.mxu0 %v1890_v1  ;;  %v157_v15 = vld [vmem:[#allocation2 + $0x10] sm:$0xff]  ;;  %v182_v17 = vld [vmem:[#allocation5 + $0x10] sm:$0xff]  ;;  %v208_v20 = vmul.f32 %v183_v18, %v158_v16  ;;  %v159_v22 = vld [vmem:[#allocation2 + $0x20] sm:$0xff]  ;;  %s3667_s21 = sld [smem:[#allocation33_spill]] }
  0x2f   :  { %v246_v14 = vpack.c.bf16 %v206_v12, %v205_v11  ;;  %v207_v19 = vmul.f32 %v182_v17, %v157_v15  ;;  %v160_v23 = vld [vmem:[#allocation2 + $0x28] sm:$0xff]  ;;  %v185_v25 = vld [vmem:[#allocation5 + $0x28] sm:$0xff]  ;;  %v162_v30 = vld [vmem:[#allocation2 + $0x38] sm:$0xff]  ;;  %s3668_s16 = sld [smem:[#allocation34_spill]] }
  0x30   :  { %v184_v24 = vld [vmem:[#allocation5 + $0x20] sm:$0xff]  ;;  %v210_v27 = vmul.f32 %v185_v25, %v160_v23  ;;  %v161_v29 = vld [vmem:[#allocation2 + $0x30] sm:$0xff]  ;;  %v186_v31 = vld [vmem:[#allocation5 + $0x30] sm:$0xff] }
  0x31   :  { %v247_v21 = vpack.c.bf16 %v208_v20, %v207_v19  ;;  %v209_v26 = vmul.f32 %v184_v24, %v159_v22  ;;  %v187_v32 = vld [vmem:[#allocation5 + $0x38] sm:$0xff]  ;;  %v211_v33 = vmul.f32 %v186_v31, %v161_v29  ;;  %v164_v37 = vld [vmem:[#allocation2 + $0x48] sm:$0xff]  ;;  %v189_v39 = vld [vmem:[#allocation5 + $0x48] sm:$0xff] }
  0x32   :  { %313 = vmatpush.bf16.msra.mxu0 %v1889_v2  ;;  %v212_v34 = vmul.f32 %v187_v32, %v162_v30  ;;  %v163_v36 = vld [vmem:[#allocation2 + $0x40] sm:$0xff]  ;;  %v188_v38 = vld [vmem:[#allocation5 + $0x40] sm:$0xff]  ;;  %v214_v41 = vmul.f32 %v189_v39, %v164_v37  ;;  %v165_v43 = vld [vmem:[#allocation2 + $0x50] sm:$0xff] }
  0x33   :  { %v248_v28 = vpack.c.bf16 %v210_v27, %v209_v26  ;;  %v213_v40 = vmul.f32 %v188_v38, %v163_v36  ;;  %v166_v44 = vld [vmem:[#allocation2 + $0x58] sm:$0xff]  ;;  %v191_v46 = vld [vmem:[#allocation5 + $0x58] sm:$0xff]  ;;  %v168_v51 = vld [vmem:[#allocation2 + $0x68] sm:$0xff]  ;;  %s1670_s27 = sshll.u32 %s3666_s25, 4  ;;  %s1671_s27 = int_to_ptr.hbm [resolvable:$true] %s1670_s27 }
  0x34   :  { %v249_v35 = vpack.c.bf16 %v212_v34, %v211_v33  ;;  %v190_v45 = vld [vmem:[#allocation5 + $0x50] sm:$0xff]  ;;  %v216_v48 = vmul.f32 %v191_v46, %v166_v44  ;;  %v167_v50 = vld [vmem:[#allocation2 + $0x60] sm:$0xff]  ;;  %v192_v52 = vld [vmem:[#allocation5 + $0x60] sm:$0xff] }
  0x35   :  { %v250_v42 = vpack.c.bf16 %v214_v41, %v213_v40  ;;  %v215_v47 = vmul.f32 %v190_v45, %v165_v43  ;;  %v193_v53 = vld [vmem:[#allocation5 + $0x68] sm:$0xff]  ;;  %v217_v54 = vmul.f32 %v192_v52, %v167_v50  ;;  %v170_v58 = vld [vmem:[#allocation2 + $0x78] sm:$0xff]  ;;  %v195_v60 = vld [vmem:[#allocation5 + $0x78] sm:$0xff] }
  0x36   :  { %314 = vmatpush.bf16.msra.mxu0 %v1888_v3  ;;  %v218_v55 = vmul.f32 %v193_v53, %v168_v51  ;;  %v169_v57 = vld [vmem:[#allocation2 + $0x70] sm:$0xff]  ;;  %v194_v59 = vld [vmem:[#allocation5 + $0x70] sm:$0xff]  ;;  %v220_v62 = vmul.f32 %v195_v60, %v170_v58  ;;  %v171_v0 = vld [vmem:[#allocation2 + $0x80] sm:$0xff] }
  0x37   :  { %v251_v49 = vpack.c.bf16 %v216_v48, %v215_v47  ;;  %v219_v61 = vmul.f32 %v194_v59, %v169_v57  ;;  %v172_v1 = vld [vmem:[#allocation2 + $0x88] sm:$0xff]  ;;  %v197_v3 = vld [vmem:[#allocation5 + $0x88] sm:$0xff]  ;;  %v2372_v8 = vld [vmem:[%s3664_s22] ss:$0 sm:$0xff] }
  0x38   :  { %v252_v56 = vpack.c.bf16 %v218_v55, %v217_v54  ;;  %v196_v2 = vld [vmem:[#allocation5 + $0x80] sm:$0xff]  ;;  %v173_v9 = vld [vmem:[#allocation2 + $0x90] sm:$0xff]  ;;  %v174_v11 = vld [vmem:[#allocation2 + $0x98] sm:$0xff] }
  0x39   :  { %v253_v63 = vpack.c.bf16 %v220_v62, %v219_v61  ;;  %v198_v12 = vld [vmem:[#allocation5 + $0x90] sm:$0xff]  ;;  %v175_v23 = vld [vmem:[#allocation2 + $0xa0] sm:$0xff]  ;;  %v176_v25 = vld [vmem:[#allocation2 + $0xa8] sm:$0xff] }
  0x3a   :  { %315 = vmatpush.bf16.msra.mxu0 %v1887_v4  ;;  %v221_v4 = vmul.f32 %v196_v2, %v171_v0  ;;  %v223_v17 = vmul.f32 %v198_v12, %v173_v9  ;;  %v200_v26 = vld [vmem:[#allocation5 + $0xa0] sm:$0xff]  ;;  %v201_v27 = vld [vmem:[#allocation5 + $0xa8] sm:$0xff]  ;;  %v178_v38 = vld [vmem:[#allocation2 + $0xb8] sm:$0xff] }
  0x3b   :  { %v225_v30 = vmul.f32 %v200_v26, %v175_v23  ;;  %v226_v31 = vmul.f32 %v201_v27, %v176_v25  ;;  %v177_v36 = vld [vmem:[#allocation2 + $0xb0] sm:$0xff]  ;;  %v202_v39 = vld [vmem:[#allocation5 + $0xb0] sm:$0xff]  ;;  %v203_v40 = vld [vmem:[#allocation5 + $0xb8] sm:$0xff] }
  0x3c   :  { %v227_v43 = vmul.f32 %v202_v39, %v177_v36  ;;  %v228_v44 = vmul.f32 %v203_v40, %v178_v38  ;;  %v179_v50 = vld [vmem:[#allocation2 + $0xc0] sm:$0xff]  ;;  %v204_v51 = vld [vmem:[#allocation5 + $0xc0] sm:$0xff] }
  0x3d   :  { %v256_v32 = vpack.c.bf16 %v226_v31, %v225_v30  ;;  %v229_v54 = vmul.f32 %v204_v51, %v179_v50 }
  0x3e   :  { %316 = vmatpush.bf16.msra.mxu0 %v1886_v5  ;;  %v222_v5 = vmul.f32 %v197_v3, %v172_v1  ;;  %v257_v45 = vpack.c.bf16 %v228_v44, %v227_v43 }
  0x3f   :  { %v258_v55 = vpack.c.bf16 %v229_v54, %v229_v54 }
  0x42   :  { %317 = vmatpush.bf16.msra.mxu0 %v1885_v6  ;;  %v254_v6 = vpack.c.bf16 %v222_v5, %v221_v4 }
  0x46   :  { %318 = vmatpush.bf16.msra.mxu0 %v1884_v13  ;;  %v199_v13 = vld [vmem:[#allocation5 + $0x98] sm:$0xff] }
  0x47   :  { %v224_v18 = vmul.f32 %v199_v13, %v174_v11 }
  0x49   :  { %319 = vmatmul.bf16.vlgmr.msra.gmra.mxu0 %v246_v14  ;;  %v255_v19 = vpack.c.bf16 %v224_v18, %v223_v17 }
  0x59   :  { %324 = vmatmul.bf16.gmra.mxu0 %v247_v21 }
  0x69   :  { %329 = vmatmul.bf16.gmra.mxu0 %v248_v28 }
  0x79   :  { %334 = vmatmul.bf16.gmra.mxu0 %v249_v35 }
  0x89   :  { %339 = vmatmul.bf16.gmra.mxu0 %v250_v42 }
  0x99   :  { %344 = vmatmul.bf16.gmra.mxu0 %v251_v49 }
  0xa9   :  { %349 = vmatmul.bf16.gmra.mxu0 %v252_v56 }
  0xb9   :  { %354 = vmatmul.bf16.gmra.mxu0 %v253_v63 }
  0xc6   :  { %v320_v7 = vpop.f32.mrf.mxu0 }
  0xc7   :  { %v2375_v14 = vadd.f32 %v2372_v8, %v320_v7 }
  0xc9   :  { %359 = vmatmul.bf16.gmra.mxu0 %v254_v6 }
  0xce   :  { %v322_v10 = vpop.f32.mrf.mxu0 }
  0xcf   :  { %v2378_v15 = vadd.f32 %v2372_v8, %v322_v10 }
  0xd1   :  { %v384_v16 = vadd.f32 %v2378_v15, %v2375_v14 }
  0xd6   :  { %v325_v20 = vpop.f32.mrf.mxu0 }
  0xd7   :  { %v2383_v21 = vadd.f32 %v2372_v8, %v325_v20 }
  0xd9   :  { %v385_v22 = vadd.f32 %v384_v16, %v2383_v21  ;;  %364 = vmatmul.bf16.gmra.mxu0 %v255_v19 }
  0xde   :  { %v327_v24 = vpop.f32.mrf.mxu0 }
  0xdf   :  { %v2387_v28 = vadd.f32 %v2372_v8, %v327_v24 }
  0xe1   :  { %v386_v29 = vadd.f32 %v385_v22, %v2387_v28 }
  0xe6   :  { %v330_v33 = vpop.f32.mrf.mxu0 }
  0xe7   :  { %v2391_v34 = vadd.f32 %v2372_v8, %v330_v33 }
  0xe9   :  { %v387_v35 = vadd.f32 %v386_v29, %v2391_v34  ;;  %369 = vmatmul.bf16.gmra.mxu0 %v256_v32 }
  0xee   :  { %v332_v37 = vpop.f32.mrf.mxu0 }
  0xef   :  { %v2395_v41 = vadd.f32 %v2372_v8, %v332_v37 }
  0xf1   :  { %v388_v42 = vadd.f32 %v387_v35, %v2395_v41 }
  0xf6   :  { %v335_v46 = vpop.f32.mrf.mxu0 }
  0xf7   :  { %v2399_v47 = vadd.f32 %v2372_v8, %v335_v46 }
  0xf9   :  { %v389_v48 = vadd.f32 %v388_v42, %v2399_v47  ;;  %374 = vmatmul.bf16.gmra.mxu0 %v257_v45 }
  0xfe   :  { %v337_v49 = vpop.f32.mrf.mxu0 }
  0xff   :  { %v2403_v52 = vadd.f32 %v2372_v8, %v337_v49 }
 0x101   :  { %v390_v53 = vadd.f32 %v389_v48, %v2403_v52 }
 0x106   :  { %v340_v56 = vpop.f32.mrf.mxu0 }
 0x107   :  { %v2407_v57 = vadd.f32 %v2372_v8, %v340_v56 }
 0x109   :  { %v391_v58 = vadd.f32 %v390_v53, %v2407_v57  ;;  %379 = vmatmul.bf16.gmra.mxu0 %v258_v55 }
 0x10e   :  { %v342_v59 = vpop.f32.mrf.mxu0 }
 0x10f   :  { %v2411_v60 = vadd.f32 %v2372_v8, %v342_v59 }
 0x111   :  { %v392_v61 = vadd.f32 %v391_v58, %v2411_v60 }
 0x116   :  { %v345_v62 = vpop.f32.mrf.mxu0 }
 0x117   :  { %v346_v63 = vadd.f32 %v2372_v8, %v345_v62 }
 0x119   :  { %v393_v0 = vadd.f32 %v392_v61, %v346_v63 }
 0x11e   :  { %v347_v1 = vpop.f32.mrf.mxu0 }
 0x11f   :  { %v348_v2 = vadd.f32 %v2372_v8, %v347_v1 }
 0x121   :  { %v394_v3 = vadd.f32 %v393_v0, %v348_v2 }
 0x126   :  { %v350_v4 = vpop.f32.mrf.mxu0 }
 0x127   :  { %v351_v5 = vadd.f32 %v2372_v8, %v350_v4 }
 0x129   :  { %v395_v6 = vadd.f32 %v394_v3, %v351_v5 }
 0x12e   :  { %v352_v7 = vpop.f32.mrf.mxu0 }
 0x12f   :  { %v353_v9 = vadd.f32 %v2372_v8, %v352_v7 }
 0x131   :  { %v396_v10 = vadd.f32 %v395_v6, %v353_v9 }
 0x136   :  { %v355_v11 = vpop.f32.mrf.mxu0 }
 0x137   :  { %v356_v12 = vadd.f32 %v2372_v8, %v355_v11 }
 0x139   :  { %v397_v13 = vadd.f32 %v396_v10, %v356_v12 }
 0x13e   :  { %v357_v16 = vpop.f32.mrf.mxu0 }
 0x13f   :  { %v2420_v24 = vadd.f32 %v2372_v8, %v357_v16 }
 0x141   :  { %v398_v27 = vadd.f32 %v397_v13, %v2420_v24 }
 0x146   :  { %v360_v17 = vpop.f32.mrf.mxu0 }
 0x147   :  { %v2423_v25 = vadd.f32 %v2372_v8, %v360_v17 }
 0x149   :  { %v399_v30 = vadd.f32 %v398_v27, %v2423_v25 }
 0x14e   :  { %v362_v18 = vpop.f32.mrf.mxu0 }
 0x14f   :  { %v2427_v29 = vadd.f32 %v2372_v8, %v362_v18 }
 0x151   :  { %v400_v32 = vadd.f32 %v399_v30, %v2427_v29 }
 0x156   :  { %v365_v19 = vpop.f32.mrf.mxu0 }
 0x157   :  { %v2431_v31 = vadd.f32 %v2372_v8, %v365_v19 }
 0x159   :  { %v401_v35 = vadd.f32 %v400_v32, %v2431_v31 }
 0x15e   :  { %v367_v20 = vpop.f32.mrf.mxu0 }
 0x15f   :  { %v2435_v33 = vadd.f32 %v2372_v8, %v367_v20 }
 0x161   :  { %v402_v38 = vadd.f32 %v401_v35, %v2435_v33 }
 0x166   :  { %v370_v22 = vpop.f32.mrf.mxu0 }
 0x167   :  { %v2439_v36 = vadd.f32 %v2372_v8, %v370_v22 }
 0x169   :  { %v403_v40 = vadd.f32 %v402_v38, %v2439_v36 }
 0x16e   :  { %v372_v23 = vpop.f32.mrf.mxu0 }
 0x16f   :  { %v2443_v39 = vadd.f32 %v2372_v8, %v372_v23 }
 0x171   :  { %v404_v43 = vadd.f32 %v403_v40, %v2443_v39 }
 0x176   :  { %v375_v26 = vpop.f32.mrf.mxu0 }
 0x177   :  { %v2447_v42 = vadd.f32 %v2372_v8, %v375_v26 }
 0x179   :  { %v405_v45 = vadd.f32 %v404_v43, %v2447_v42 }
 0x17e   :  { %v377_v37 = vpop.f32.mrf.mxu0 }
 0x17f   :  { %v2451_v44 = vadd.f32 %v2372_v8, %v377_v37 }
 0x181   :  { %v406_v48 = vadd.f32 %v405_v45, %v2451_v44 }
 0x186   :  { %v380_v46 = vpop.f32.mrf.mxu0 }
 0x187   :  { %v2456_v49 = vadd.f32 %v2372_v8, %v380_v46 }
 0x189   :  { %v407_v50 = vadd.f32 %v406_v48, %v2456_v49 }
 0x18b   :  { %v408_v51 = vrot.slane %v407_v50, 4 }
 0x18d   :  { %v409_v53 = vadd.f32 %v408_v51, %v407_v50 }
 0x18e   :  { %v382_v54 = vpop.f32.mrf.mxu0 }
 0x18f   :  { %v410_v55 = vrot.slane %v409_v53, 2 }
 0x191   :  { %v411_v56 = vadd.f32 %v410_v55, %v409_v53  ;;  %v1899_v55 = vld [vmem:[#allocation8 + $0x38] sm:$0xff] }
 0x192   :  { %721 = vmatpush.bf16.msra.mxu1 %v1899_v55  ;;  %v2605_v55 = vld [vmem:[%s3665_s24] ss:$0 sm:$0xff] }
 0x193   :  { %v412_v58 = vrot.slane %v411_v56, 1 }
 0x195   :  { %v413_v59 = vadd.f32 %v412_v58, %v411_v56 }
 0x197   :  { %v2459_v61 = vmul.f32 0.005, %v413_v59 }
 0x199   :  { %v2463_v62 = vsub.f32 %v2375_v14, %v2459_v61  ;;  %v2467_v0 = vsub.f32 %v2378_v15, %v2459_v61  ;;  %v2471_v8 = vsub.f32 %v2383_v21, %v2459_v61  ;;  %v2475_v1 = vsub.f32 %v2387_v28, %v2459_v61 }
 0x19a   :  { %v2479_v3 = vsub.f32 %v2391_v34, %v2459_v61  ;;  %v2483_v14 = vsub.f32 %v2395_v41, %v2459_v61  ;;  %v2487_v15 = vsub.f32 %v2399_v47, %v2459_v61  ;;  %v2491_v21 = vsub.f32 %v2403_v52, %v2459_v61 }
 0x19b   :  { %v2495_v28 = vsub.f32 %v2407_v57, %v2459_v61  ;;  %v2499_v34 = vsub.f32 %v2411_v60, %v2459_v61  ;;  %v2502_v4 = vsub.f32 %v346_v63, %v2459_v61  ;;  %v2505_v41 = vsub.f32 %v348_v2, %v2459_v61 }
 0x19c   :  { %v2508_v47 = vsub.f32 %v351_v5, %v2459_v61  ;;  %v2511_v52 = vsub.f32 %v353_v9, %v2459_v61  ;;  %v2514_v6 = vsub.f32 %v356_v12, %v2459_v61  ;;  %v440_v57 = vmul.f32 %v2463_v62, %v2463_v62 }
 0x19d   :  { %v441_v60 = vmul.f32 %v2467_v0, %v2467_v0  ;;  %v442_v63 = vmul.f32 %v2471_v8, %v2471_v8  ;;  %v443_v5 = vmul.f32 %v2475_v1, %v2475_v1  ;;  %v444_v9 = vmul.f32 %v2479_v3, %v2479_v3 }
 0x19e   :  { %v445_v11 = vmul.f32 %v2483_v14, %v2483_v14  ;;  %v446_v13 = vmul.f32 %v2487_v15, %v2487_v15  ;;  %v447_v17 = vmul.f32 %v2491_v21, %v2491_v21  ;;  %v448_v19 = vmul.f32 %v2495_v28, %v2495_v28 }
 0x19f   :  { %v465_v2 = vadd.f32 %v441_v60, %v440_v57  ;;  %v449_v22 = vmul.f32 %v2499_v34, %v2499_v34  ;;  %v450_v26 = vmul.f32 %v2502_v4, %v2502_v4  ;;  %v451_v30 = vmul.f32 %v2505_v41, %v2505_v41  ;;  %v1898_v60 = vld [vmem:[#allocation8 + $0x30] sm:$0xff] }
 0x1a0   :  { %v452_v35 = vmul.f32 %v2508_v47, %v2508_v47  ;;  %v2544_v38 = vsub.f32 %v2420_v24, %v2459_v61  ;;  %v453_v40 = vmul.f32 %v2511_v52, %v2511_v52  ;;  %v2550_v45 = vsub.f32 %v2423_v25, %v2459_v61  ;;  %722 = vmatpush.bf16.msra.mxu1 %v1898_v60  ;;  %v2617_v60 = vld [vmem:[%s3634_s5] ss:$0 sm:$0xff]  ;;  %s2237_s5 = smov [#allocation13]  }
 0x1a1   :  { %v466_v7 = vadd.f32 %v465_v2, %v442_v63  ;;  %v454_v46 = vmul.f32 %v2514_v6, %v2514_v6  ;;  %v2556_v50 = vsub.f32 %v2427_v29, %v2459_v61  ;;  %v2562_v53 = vsub.f32 %v2431_v31, %v2459_v61  ;;  %s1668_s28 = sshll.u32 %s2237_s5, 4  ;;  %s1669_s28 = int_to_ptr.vmem [resolvable:$true] %s1668_s28 }
 0x1a2   :  { %v455_v24 = vmul.f32 %v2544_v38, %v2544_v38  ;;  %v456_v25 = vmul.f32 %v2550_v45, %v2550_v45  ;;  %v2568_v56 = vsub.f32 %v2435_v33, %v2459_v61  ;;  %v2574_v59 = vsub.f32 %v2439_v36, %v2459_v61 }
 0x1a3   :  { %v467_v10 = vadd.f32 %v466_v7, %v443_v5  ;;  %v457_v29 = vmul.f32 %v2556_v50, %v2556_v50  ;;  %v458_v31 = vmul.f32 %v2562_v53, %v2562_v53  ;;  %v2580_v63 = vsub.f32 %v2443_v39, %v2459_v61 }
 0x1a4   :  { %v459_v33 = vmul.f32 %v2568_v56, %v2568_v56  ;;  %v2586_v5 = vsub.f32 %v2447_v42, %v2459_v61  ;;  %v460_v36 = vmul.f32 %v2574_v59, %v2574_v59 }
 0x1a5   :  { %v468_v12 = vadd.f32 %v467_v10, %v444_v9  ;;  %v1897_v9 = vld [vmem:[#allocation8 + $0x28] sm:$0xff]  ;;  %v2592_v10 = vsub.f32 %v2451_v44, %v2459_v61  ;;  %v461_v39 = vmul.f32 %v2580_v63, %v2580_v63 }
 0x1a6   :  { %723 = vmatpush.bf16.msra.mxu1 %v1897_v9  ;;  %v462_v42 = vmul.f32 %v2586_v5, %v2586_v5 }
 0x1a7   :  { %v469_v16 = vadd.f32 %v468_v12, %v445_v11  ;;  %v439_v12 = vsub.f32 %v2456_v49, %v2459_v61  ;;  %v1893_v61 = vld [vmem:[#allocation8 + $0x8] sm:$0xff] }
 0x1a9   :  { %v470_v18 = vadd.f32 %v469_v16, %v446_v13  ;;  %v1896_v16 = vld [vmem:[#allocation8 + $0x20] sm:$0xff]  ;;  %v464_v44 = vmul.f32 %v439_v12, %v439_v12 }
 0x1aa   :  { %724 = vmatpush.bf16.msra.mxu1 %v1896_v16 }
 0x1ab   :  { %v471_v20 = vadd.f32 %v470_v18, %v447_v17  ;;  %v463_v17 = vmul.f32 %v2592_v10, %v2592_v10 }
 0x1ad   :  { %v472_v23 = vadd.f32 %v471_v20, %v448_v19  ;;  %v1895_v20 = vld [vmem:[#allocation8 + $0x18] sm:$0xff] }
 0x1ae   :  { %725 = vmatpush.bf16.msra.mxu1 %v1895_v20 }
 0x1af   :  { %v473_v27 = vadd.f32 %v472_v23, %v449_v22 }
 0x1b1   :  { %v474_v32 = vadd.f32 %v473_v27, %v450_v26  ;;  %v1894_v26 = vld [vmem:[#allocation8 + $0x10] sm:$0xff] }
 0x1b2   :  { %726 = vmatpush.bf16.msra.mxu1 %v1894_v26 }
 0x1b3   :  { %v475_v37 = vadd.f32 %v474_v32, %v451_v30  ;;  %v1892_v32 = vld [vmem:[#allocation8] sm:$0xff] }
 0x1b5   :  { %v476_v43 = vadd.f32 %v475_v37, %v452_v35 }
 0x1b6   :  { %727 = vmatpush.bf16.msra.mxu1 %v1893_v61 }
 0x1b7   :  { %v477_v48 = vadd.f32 %v476_v43, %v453_v40 }
 0x1b9   :  { %v478_v51 = vadd.f32 %v477_v48, %v454_v46 }
 0x1ba   :  { %728 = vmatpush.bf16.msra.mxu1 %v1892_v32 }
 0x1bb   :  { %v479_v54 = vadd.f32 %v478_v51, %v455_v24 }
 0x1bd   :  { %v480_v58 = vadd.f32 %v479_v54, %v456_v25 }
 0x1bf   :  { %v481_v57 = vadd.f32 %v480_v58, %v457_v29 }
 0x1c1   :  { %v482_v2 = vadd.f32 %v481_v57, %v458_v31 }
 0x1c3   :  { %v483_v7 = vadd.f32 %v482_v2, %v459_v33 }
 0x1c5   :  { %v484_v11 = vadd.f32 %v483_v7, %v460_v36 }
 0x1c7   :  { %v485_v13 = vadd.f32 %v484_v11, %v461_v39 }
 0x1c9   :  { %v486_v18 = vadd.f32 %v485_v13, %v462_v42 }
 0x1cb   :  { %v487_v19 = vadd.f32 %v486_v18, %v463_v17 }
 0x1cd   :  { %v488_v22 = vadd.f32 %v487_v19, %v464_v44 }
 0x1cf   :  { %v489_v23 = vrot.slane %v488_v22, 4 }
 0x1d1   :  { %v490_v27 = vadd.f32 %v489_v23, %v488_v22 }
 0x1d3   :  { %v491_v49 = vrot.slane %v490_v27, 2 }
 0x1d5   :  { %v492_v30 = vadd.f32 %v491_v49, %v490_v27 }
 0x1d7   :  { %v493_v35 = vrot.slane %v492_v30, 1 }
 0x1d9   :  { %v494_v37 = vadd.f32 %v493_v35, %v492_v30 }
 0x1db   :  { %v495_v40 = vmul.f32 0.005, %v494_v37 }
 0x1dd   :  { %v496_v43 = vadd.f32 1e-05, %v495_v40 }
 0x1df   :  { %1941 = vrsqrt.f32 %v496_v43  ;;  %vm503_vm1 = vweird.f32 %v496_v43 }
 0x1e5   :  { %v1942_v46 = vpop.eup %1941 }
 0x1e6   :  { %v498_v48 = vmul.f32 %v1942_v46, %v496_v43  ;;  %vm504_vm0 = vweird.f32 %v1942_v46 }
 0x1e7   :  { %vm505_vm2 = vmor %vm503_vm1, %vm504_vm0 }
 0x1e8   :  { %v499_v24 = vmul.f32 %v1942_v46, %v498_v48 }
 0x1ea   :  { %v500_v51 = vmul.f32 0.5, %v499_v24 }
 0x1ec   :  { %v501_v25 = vsub.f32 1.5, %v500_v51 }
 0x1ee   :  { %v502_v54 = vmul.f32 %v1942_v46, %v501_v25 }
 0x1f0   :  { %v2607_v29 = vsel %vm505_vm2, %v1942_v46, %v502_v54 }
 0x1f1   :  { %v531_v58 = vmul.f32 %v2607_v29, %v439_v12  ;;  %v507_v31 = vmul.f32 %v2607_v29, %v2463_v62  ;;  %v508_v57 = vmul.f32 %v2607_v29, %v2467_v0  ;;  %v509_v33 = vmul.f32 %v2607_v29, %v2471_v8 }
 0x1f2   :  { %v510_v2 = vmul.f32 %v2607_v29, %v2475_v1  ;;  %v2632_v39 = vmul.f32 %v2607_v29, %v2479_v3  ;;  %v2639_v12 = vmul.f32 %v2607_v29, %v2483_v14  ;;  %v2644_v13 = vmul.f32 %v2607_v29, %v2487_v15 }
 0x1f3   :  { %556 = vst [vmem:[#allocation13 + $0xc0] sm:$0xff] %v531_v58  ;;  %v2624_v36 = vmul.f32 %v2605_v55, %v531_v58  ;;  %v561_v62 = vmul.f32 %v2605_v55, %v507_v31  ;;  %v562_v7 = vmul.f32 %v2605_v55, %v508_v57  ;;  %v563_v0 = vmul.f32 %v2605_v55, %v509_v33 }
 0x1f4   :  { %532 = vst [vmem:[#allocation13] sm:$0xff] %v507_v31  ;;  %v564_v9 = vmul.f32 %v2605_v55, %v510_v2  ;;  %v2648_v17 = vmul.f32 %v2607_v29, %v2491_v21  ;;  %v515_v19 = vmul.f32 %v2607_v29, %v2495_v28  ;;  %v516_v15 = vmul.f32 %v2607_v29, %v2499_v34 }
 0x1f5   :  { %533 = vst [vmem:[#allocation13 + $0x8] sm:$0xff] %v508_v57  ;;  %v590_v8 = vadd.f32 %v2617_v60, %v561_v62  ;;  %v591_v1 = vadd.f32 %v2617_v60, %v562_v7  ;;  %v592_v11 = vadd.f32 %v2617_v60, %v563_v0  ;;  %v517_v20 = vmul.f32 %v2607_v29, %v2502_v4 }
 0x1f6   :  { %534 = vst [vmem:[#allocation13 + $0x10] sm:$0xff] %v509_v33  ;;  %v593_v42 = vadd.f32 %v2617_v60, %v564_v9  ;;  %v569_v21 = vmul.f32 %v2605_v55, %v515_v19  ;;  %v570_v22 = vmul.f32 %v2605_v55, %v516_v15  ;;  %v518_v23 = vmul.f32 %v2607_v29, %v2505_v41 }
 0x1f7   :  { %v615_v3 = vmax.f32 %v590_v8, 0.0  ;;  %v616_v16 = vmax.f32 %v591_v1, 0.0  ;;  %535 = vst [vmem:[#allocation13 + $0x18] sm:$0xff] %v510_v2  ;;  %v617_v18 = vmax.f32 %v592_v11, 0.0  ;;  %v571_v28 = vmul.f32 %v2605_v55, %v517_v20 }
 0x1f8   :  { %v618_v44 = vmax.f32 %v593_v42, 0.0  ;;  %536 = vst [vmem:[#allocation13 + $0x20] sm:$0xff] %v2632_v39  ;;  %v519_v34 = vmul.f32 %v2607_v29, %v2508_v47  ;;  %v520_v4 = vmul.f32 %v2607_v29, %v2511_v52  ;;  %v598_v27 = vadd.f32 %v2617_v60, %v569_v21 }
 0x1f9   :  { %v656_v14 = vpack.c.bf16 %v616_v16, %v615_v3  ;;  %537 = vst [vmem:[#allocation13 + $0x28] sm:$0xff] %v2639_v12  ;;  %v599_v49 = vadd.f32 %v2617_v60, %v570_v22  ;;  %v572_v61 = vmul.f32 %v2605_v55, %v518_v23  ;;  %v521_v41 = vmul.f32 %v2607_v29, %v2514_v6 }
 0x1fa   :  { %538 = vst [vmem:[#allocation13 + $0x30] sm:$0xff] %v2644_v13  ;;  %v2664_v26 = vpack.c.bf16 %v618_v44, %v617_v18  ;;  %v600_v30 = vadd.f32 %v2617_v60, %v571_v28  ;;  %v573_v32 = vmul.f32 %v2605_v55, %v519_v34  ;;  %v574_v47 = vmul.f32 %v2605_v55, %v520_v4 }
 0x1fb   :  { %729 = vmatmul.bf16.vlgmr.msra.gmra.mxu1 %v656_v14  ;;  %539 = vst [vmem:[#allocation13 + $0x38] sm:$0xff] %v2648_v17  ;;  %v522_v52 = vmul.f32 %v2607_v29, %v2544_v38  ;;  %v623_v35 = vmax.f32 %v598_v27, 0.0  ;;  %v624_v37 = vmax.f32 %v599_v49, 0.0  ;;  %v601_v40 = vadd.f32 %v2617_v60, %v572_v61 }
 0x1fc   :  { %540 = vst [vmem:[#allocation13 + $0x40] sm:$0xff] %v515_v19  ;;  %v575_v43 = vmul.f32 %v2605_v55, %v521_v41  ;;  %v625_v46 = vmax.f32 %v600_v30, 0.0  ;;  %v602_v6 = vadd.f32 %v2617_v60, %v573_v32  ;;  %v603_v48 = vadd.f32 %v2617_v60, %v574_v47 }
 0x1fd   :  { %541 = vst [vmem:[#allocation13 + $0x48] sm:$0xff] %v516_v15  ;;  %v576_v24 = vmul.f32 %v2605_v55, %v522_v52  ;;  %v2686_v51 = vpack.c.bf16 %v624_v37, %v623_v35  ;;  %v626_v25 = vmax.f32 %v601_v40, 0.0  ;;  %v523_v54 = vmul.f32 %v2607_v29, %v2550_v45 }
 0x1fe   :  { %542 = vst [vmem:[#allocation13 + $0x50] sm:$0xff] %v517_v20  ;;  %v604_v38 = vadd.f32 %v2617_v60, %v575_v43  ;;  %v627_v58 = vmax.f32 %v602_v6, 0.0  ;;  %v628_v31 = vmax.f32 %v603_v48, 0.0  ;;  %v524_v33 = vmul.f32 %v2607_v29, %v2556_v50 }
 0x1ff   :  { %543 = vst [vmem:[#allocation13 + $0x58] sm:$0xff] %v518_v23  ;;  %v605_v57 = vadd.f32 %v2617_v60, %v576_v24  ;;  %v2694_v2 = vpack.c.bf16 %v626_v25, %v625_v46  ;;  %v577_v7 = vmul.f32 %v2605_v55, %v523_v54  ;;  %v525_v0 = vmul.f32 %v2607_v29, %v2562_v53 }
 0x200   :  { %544 = vst [vmem:[#allocation13 + $0x60] sm:$0xff] %v519_v34  ;;  %v629_v62 = vmax.f32 %v604_v38, 0.0  ;;  %v662_v9 = vpack.c.bf16 %v628_v31, %v627_v58  ;;  %v578_v45 = vmul.f32 %v2605_v55, %v524_v33  ;;  %v526_v1 = vmul.f32 %v2607_v29, %v2568_v56 }
 0x201   :  { %545 = vst [vmem:[#allocation13 + $0x68] sm:$0xff] %v520_v4  ;;  %v630_v8 = vmax.f32 %v605_v57, 0.0  ;;  %v606_v50 = vadd.f32 %v2617_v60, %v577_v7  ;;  %v579_v11 = vmul.f32 %v2605_v55, %v525_v0  ;;  %v527_v42 = vmul.f32 %v2607_v29, %v2574_v59 }
 0x202   :  { %546 = vst [vmem:[#allocation13 + $0x70] sm:$0xff] %v521_v41  ;;  %v528_v3 = vmul.f32 %v2607_v29, %v2580_v63  ;;  %v607_v16 = vadd.f32 %v2617_v60, %v578_v45  ;;  %v580_v18 = vmul.f32 %v2605_v55, %v526_v1  ;;  %v529_v56 = vmul.f32 %v2607_v29, %v2586_v5 }
 0x203   :  { %547 = vst [vmem:[#allocation13 + $0x78] sm:$0xff] %v522_v52  ;;  %v663_v53 = vpack.c.bf16 %v630_v8, %v629_v62  ;;  %v631_v44 = vmax.f32 %v606_v50, 0.0  ;;  %v608_v14 = vadd.f32 %v2617_v60, %v579_v11  ;;  %v581_v19 = vmul.f32 %v2605_v55, %v527_v42 }
 0x204   :  { %548 = vst [vmem:[#allocation13 + $0x80] sm:$0xff] %v523_v54  ;;  %v582_v59 = vmul.f32 %v2605_v55, %v528_v3  ;;  %v632_v15 = vmax.f32 %v607_v16, 0.0  ;;  %v609_v63 = vadd.f32 %v2617_v60, %v580_v18  ;;  %v530_v20 = vmul.f32 %v2607_v29, %v2592_v10 }
 0x205   :  { %549 = vst [vmem:[#allocation13 + $0x88] sm:$0xff] %v524_v33  ;;  %v583_v21 = vmul.f32 %v2605_v55, %v529_v56  ;;  %v633_v22 = vmax.f32 %v608_v14, 0.0  ;;  %v610_v5 = vadd.f32 %v2617_v60, %v581_v19  ;;  %v2723_v28 = vadd.f32 %v2617_v60, %v2624_v36 }
 0x206   :  { %550 = vst [vmem:[#allocation13 + $0x90] sm:$0xff] %v525_v0  ;;  %v611_v23 = vadd.f32 %v2617_v60, %v582_v59  ;;  %v664_v34 = vpack.c.bf16 %v632_v15, %v631_v44  ;;  %v634_v4 = vmax.f32 %v609_v63, 0.0  ;;  %v584_v27 = vmul.f32 %v2605_v55, %v530_v20 }
 0x207   :  { %551 = vst [vmem:[#allocation13 + $0x98] sm:$0xff] %v526_v1  ;;  %v612_v49 = vadd.f32 %v2617_v60, %v583_v21  ;;  %v635_v10 = vmax.f32 %v610_v5, 0.0  ;;  %v565_v36 = vmul.f32 %v2605_v55, %v2632_v39  ;;  %v566_v32 = vmul.f32 %v2605_v55, %v2639_v12 }
 0x208   :  { %552 = vst [vmem:[#allocation13 + $0xa0] sm:$0xff] %v527_v42  ;;  %v636_v29 = vmax.f32 %v611_v23, 0.0  ;;  %v665_v61 = vpack.c.bf16 %v634_v4, %v633_v22  ;;  %v613_v41 = vadd.f32 %v2617_v60, %v584_v27  ;;  %v567_v6 = vmul.f32 %v2605_v55, %v2644_v13 }
 0x209   :  { %553 = vst [vmem:[#allocation13 + $0xa8] sm:$0xff] %v528_v3  ;;  %v637_v30 = vmax.f32 %v612_v49, 0.0  ;;  %v594_v37 = vadd.f32 %v2617_v60, %v565_v36  ;;  %v568_v39 = vmul.f32 %v2605_v55, %v2648_v17  ;;  %v2746_v55 = vld [vmem:[%s3636_s7] ss:$0 sm:$0xff]  ;;  %v639_v18 = vmax.f32 %v2723_v28, 0.0  ;;  %s1694_s7 = sshll.u32 %s2238_s19, 4  ;;  %s1695_s7 = int_to_ptr.vmem [resolvable:$true] %s1694_s7 }
 0x20a   :  { %554 = vst [vmem:[#allocation13 + $0xb0] sm:$0xff] %v529_v56  ;;  %v666_v47 = vpack.c.bf16 %v636_v29, %v635_v10  ;;  %v638_v52 = vmax.f32 %v613_v41, 0.0  ;;  %v596_v48 = vadd.f32 %v2617_v60, %v567_v6 }
 0x20b   :  { %734 = vmatmul.bf16.gmra.mxu1 %v2664_v26  ;;  %555 = vst [vmem:[#allocation13 + $0xb8] sm:$0xff] %v530_v20  ;;  %v595_v26 = vadd.f32 %v2617_v60, %v566_v32  ;;  %v619_v40 = vmax.f32 %v594_v37, 0.0  ;;  %v597_v12 = vadd.f32 %v2617_v60, %v568_v39  ;;  %v668_v14 = vpack.c.bf16 %v639_v18, %v639_v18 }
 0x20c   :  { %v667_v35 = vpack.c.bf16 %v638_v52, %v637_v30  ;;  %v621_v24 = vmax.f32 %v596_v48, 0.0  ;;  %1676 = dma.vmem_to_hbm [thread:$0]  %s1669_s28, 3200, %s1671_s27, [#allocation4], %s3663_s6, %s3663_s6, %s2227_s26  }
 0x20d   :  { %v620_v43 = vmax.f32 %v595_v26, 0.0  ;;  %v622_v25 = vmax.f32 %v597_v12, 0.0 }
 0x20f   :  { %v658_v46 = vpack.c.bf16 %v620_v43, %v619_v40  ;;  %v659_v38 = vpack.c.bf16 %v622_v25, %v621_v24 }
 0x21b   :  { %739 = vmatmul.bf16.gmra.mxu1 %v658_v46 }
 0x22b   :  { %744 = vmatmul.bf16.gmra.mxu1 %v659_v38 }
 0x23b   :  { %749 = vmatmul.bf16.gmra.mxu1 %v2686_v51 }
 0x24b   :  { %754 = vmatmul.bf16.gmra.mxu1 %v2694_v2 }
 0x25b   :  { %759 = vmatmul.bf16.gmra.mxu1 %v662_v9 }
 0x26b   :  { %764 = vmatmul.bf16.gmra.mxu1 %v663_v53 }
 0x278   :  { %v730_v54 = vpop.f32.mrf.mxu1 }
 0x279   :  { %v2749_v60 = vadd.f32 %v2746_v55, %v730_v54 }
 0x27b   :  { %769 = vmatmul.bf16.gmra.mxu1 %v664_v34 }
 0x280   :  { %v732_v13 = vpop.f32.mrf.mxu1 }
 0x281   :  { %v2752_v17 = vadd.f32 %v2746_v55, %v732_v13 }
 0x283   :  { %v794_v51 = vadd.f32 %v2752_v17, %v2749_v60 }
 0x288   :  { %v735_v58 = vpop.f32.mrf.mxu1 }
 0x289   :  { %v2757_v31 = vadd.f32 %v2746_v55, %v735_v58 }
 0x28b   :  { %v795_v57 = vadd.f32 %v794_v51, %v2757_v31  ;;  %774 = vmatmul.bf16.gmra.mxu1 %v665_v61 }
 0x290   :  { %v737_v33 = vpop.f32.mrf.mxu1 }
 0x291   :  { %v2761_v2 = vadd.f32 %v2746_v55, %v737_v33 }
 0x293   :  { %v796_v62 = vadd.f32 %v795_v57, %v2761_v2 }
 0x298   :  { %v740_v7 = vpop.f32.mrf.mxu1 }
 0x299   :  { %v2765_v0 = vadd.f32 %v2746_v55, %v740_v7 }
 0x29b   :  { %v797_v9 = vadd.f32 %v796_v62, %v2765_v0  ;;  %779 = vmatmul.bf16.gmra.mxu1 %v666_v47 }
 0x2a0   :  { %v742_v8 = vpop.f32.mrf.mxu1 }
 0x2a1   :  { %v2769_v45 = vadd.f32 %v2746_v55, %v742_v8 }
 0x2a3   :  { %v798_v1 = vadd.f32 %v797_v9, %v2769_v45 }
 0x2a8   :  { %v745_v50 = vpop.f32.mrf.mxu1 }
 0x2a9   :  { %v2773_v11 = vadd.f32 %v2746_v55, %v745_v50 }
 0x2ab   :  { %v799_v42 = vadd.f32 %v798_v1, %v2773_v11  ;;  %784 = vmatmul.bf16.gmra.mxu1 %v667_v35 }
 0x2b0   :  { %v747_v3 = vpop.f32.mrf.mxu1 }
 0x2b1   :  { %v2777_v53 = vadd.f32 %v2746_v55, %v747_v3 }
 0x2b3   :  { %v800_v16 = vadd.f32 %v799_v42, %v2777_v53 }
 0x2b8   :  { %v750_v56 = vpop.f32.mrf.mxu1 }
 0x2b9   :  { %v2782_v44 = vadd.f32 %v2746_v55, %v750_v56 }
 0x2bb   :  { %v801_v19 = vadd.f32 %v800_v16, %v2782_v44  ;;  %789 = vmatmul.bf16.gmra.mxu1 %v668_v14 }
 0x2c0   :  { %v752_v59 = vpop.f32.mrf.mxu1 }
 0x2c1   :  { %v2786_v15 = vadd.f32 %v2746_v55, %v752_v59 }
 0x2c3   :  { %v802_v63 = vadd.f32 %v801_v19, %v2786_v15 }
 0x2c8   :  { %v755_v20 = vpop.f32.mrf.mxu1 }
 0x2c9   :  { %v756_v21 = vadd.f32 %v2746_v55, %v755_v20 }
 0x2cb   :  { %v803_v22 = vadd.f32 %v802_v63, %v756_v21 }
 0x2d0   :  { %v757_v5 = vpop.f32.mrf.mxu1 }
 0x2d1   :  { %v758_v23 = vadd.f32 %v2746_v55, %v757_v5 }
 0x2d3   :  { %v804_v28 = vadd.f32 %v803_v22, %v758_v23 }
 0x2d8   :  { %v760_v34 = vpop.f32.mrf.mxu1 }
 0x2d9   :  { %v761_v4 = vadd.f32 %v2746_v55, %v760_v34 }
 0x2db   :  { %v805_v27 = vadd.f32 %v804_v28, %v761_v4 }
 0x2e0   :  { %v762_v49 = vpop.f32.mrf.mxu1 }
 0x2e1   :  { %v763_v10 = vadd.f32 %v2746_v55, %v762_v49 }
 0x2e3   :  { %v806_v29 = vadd.f32 %v805_v27, %v763_v10 }
 0x2e8   :  { %v765_v61 = vpop.f32.mrf.mxu1 }
 0x2e9   :  { %v766_v41 = vadd.f32 %v2746_v55, %v765_v61 }
 0x2eb   :  { %v807_v30 = vadd.f32 %v806_v29, %v766_v41 }
 0x2f0   :  { %v767_v36 = vpop.f32.mrf.mxu1 }
 0x2f1   :  { %v2795_v40 = vadd.f32 %v2746_v55, %v767_v36 }
 0x2f3   :  { %v808_v6 = vadd.f32 %v807_v30, %v2795_v40 }
 0x2f8   :  { %v770_v32 = vpop.f32.mrf.mxu1 }
 0x2f9   :  { %v2798_v43 = vadd.f32 %v2746_v55, %v770_v32 }
 0x2fb   :  { %v809_v48 = vadd.f32 %v808_v6, %v2798_v43 }
 0x300   :  { %v772_v47 = vpop.f32.mrf.mxu1 }
 0x301   :  { %v2802_v39 = vadd.f32 %v2746_v55, %v772_v47 }
 0x303   :  { %v810_v24 = vadd.f32 %v809_v48, %v2802_v39 }
 0x308   :  { %v775_v52 = vpop.f32.mrf.mxu1 }
 0x309   :  { %v2806_v12 = vadd.f32 %v2746_v55, %v775_v52 }
 0x30b   :  { %v811_v38 = vadd.f32 %v810_v24, %v2806_v12 }
 0x310   :  { %v777_v35 = vpop.f32.mrf.mxu1 }
 0x311   :  { %v2810_v25 = vadd.f32 %v2746_v55, %v777_v35 }
 0x313   :  { %v812_v51 = vadd.f32 %v811_v38, %v2810_v25 }
 0x318   :  { %v780_v37 = vpop.f32.mrf.mxu1 }
 0x319   :  { %v2814_v54 = vadd.f32 %v2746_v55, %v780_v37 }
 0x31b   :  { %v813_v57 = vadd.f32 %v812_v51, %v2814_v54 }
 0x320   :  { %v782_v26 = vpop.f32.mrf.mxu1 }
 0x321   :  { %v2818_v58 = vadd.f32 %v2746_v55, %v782_v26 }
 0x323   :  { %v814_v62 = vadd.f32 %v813_v57, %v2818_v58 }
 0x328   :  { %v785_v46 = vpop.f32.mrf.mxu1 }
 0x329   :  { %v2822_v33 = vadd.f32 %v2746_v55, %v785_v46 }
 0x32b   :  { %v815_v9 = vadd.f32 %v814_v62, %v2822_v33 }
 0x330   :  { %v787_v13 = vpop.f32.mrf.mxu1 }
 0x331   :  { %v2826_v7 = vadd.f32 %v2746_v55, %v787_v13 }
 0x333   :  { %v816_v1 = vadd.f32 %v815_v9, %v2826_v7 }
 0x338   :  { %v790_v8 = vpop.f32.mrf.mxu1 }
 0x339   :  { %v2831_v50 = vadd.f32 %v2746_v55, %v790_v8 }
 0x33b   :  { %v817_v42 = vadd.f32 %v816_v1, %v2831_v50 }
 0x33d   :  { %v818_v3 = vrot.slane %v817_v42, 4 }
 0x33f   :  { %v819_v16 = vadd.f32 %v818_v3, %v817_v42 }
 0x340   :  { %v792_v18 = vpop.f32.mrf.mxu1 }
 0x341   :  { %v820_v56 = vrot.slane %v819_v16, 2 }
 0x343   :  { %v821_v14 = vadd.f32 %v820_v56, %v819_v16 }
 0x345   :  { %v822_v19 = vrot.slane %v821_v14, 1 }
 0x347   :  { %v823_v59 = vadd.f32 %v822_v19, %v821_v14 }
 0x349   :  { %v2834_v63 = vmul.f32 0.005, %v823_v59 }
 0x34b   :  { %v2838_v20 = vsub.f32 %v2749_v60, %v2834_v63  ;;  %v2842_v22 = vsub.f32 %v2752_v17, %v2834_v63  ;;  %v2846_v55 = vsub.f32 %v2757_v31, %v2834_v63  ;;  %v2850_v5 = vsub.f32 %v2761_v2, %v2834_v63 }
 0x34c   :  { %v2854_v28 = vsub.f32 %v2765_v0, %v2834_v63  ;;  %v2858_v60 = vsub.f32 %v2769_v45, %v2834_v63  ;;  %v2862_v17 = vsub.f32 %v2773_v11, %v2834_v63  ;;  %v2866_v31 = vsub.f32 %v2777_v53, %v2834_v63 }
 0x34d   :  { %v2870_v2 = vsub.f32 %v2782_v44, %v2834_v63  ;;  %v2874_v0 = vsub.f32 %v2786_v15, %v2834_v63  ;;  %v2877_v34 = vsub.f32 %v756_v21, %v2834_v63  ;;  %v2880_v45 = vsub.f32 %v758_v23, %v2834_v63 }
 0x34e   :  { %v2883_v11 = vsub.f32 %v761_v4, %v2834_v63  ;;  %v2886_v53 = vsub.f32 %v763_v10, %v2834_v63  ;;  %v2889_v27 = vsub.f32 %v766_v41, %v2834_v63  ;;  %v850_v44 = vmul.f32 %v2838_v20, %v2838_v20 }
 0x34f   :  { %v851_v15 = vmul.f32 %v2842_v22, %v2842_v22  ;;  %v852_v21 = vmul.f32 %v2846_v55, %v2846_v55  ;;  %v853_v4 = vmul.f32 %v2850_v5, %v2850_v5  ;;  %v854_v10 = vmul.f32 %v2854_v28, %v2854_v28 }
 0x350   :  { %v855_v61 = vmul.f32 %v2858_v60, %v2858_v60  ;;  %v856_v30 = vmul.f32 %v2862_v17, %v2862_v17  ;;  %v857_v32 = vmul.f32 %v2866_v31, %v2866_v31  ;;  %v858_v52 = vmul.f32 %v2870_v2, %v2870_v2 }
 0x351   :  { %v875_v23 = vadd.f32 %v851_v15, %v850_v44  ;;  %v859_v37 = vmul.f32 %v2874_v0, %v2874_v0  ;;  %v860_v46 = vmul.f32 %v2877_v34, %v2877_v34  ;;  %v861_v48 = vmul.f32 %v2880_v45, %v2880_v45 }
 0x352   :  { %v862_v38 = vmul.f32 %v2883_v11, %v2883_v11  ;;  %v2919_v51 = vsub.f32 %v2795_v40, %v2834_v63  ;;  %v863_v57 = vmul.f32 %v2886_v53, %v2886_v53  ;;  %v2925_v9 = vsub.f32 %v2798_v43, %v2834_v63 }
 0x353   :  { %v876_v49 = vadd.f32 %v875_v23, %v852_v21  ;;  %v864_v8 = vmul.f32 %v2889_v27, %v2889_v27  ;;  %v2931_v42 = vsub.f32 %v2802_v39, %v2834_v63  ;;  %v2937_v16 = vsub.f32 %v2806_v12, %v2834_v63 }
 0x354   :  { %v865_v40 = vmul.f32 %v2919_v51, %v2919_v51  ;;  %v866_v43 = vmul.f32 %v2925_v9, %v2925_v9  ;;  %v2943_v56 = vsub.f32 %v2810_v25, %v2834_v63  ;;  %v2949_v19 = vsub.f32 %v2814_v54, %v2834_v63 }
 0x355   :  { %v877_v29 = vadd.f32 %v876_v49, %v853_v4  ;;  %v867_v39 = vmul.f32 %v2931_v42, %v2931_v42  ;;  %v868_v12 = vmul.f32 %v2937_v16, %v2937_v16  ;;  %v2955_v44 = vsub.f32 %v2818_v58, %v2834_v63 }
 0x356   :  { %v869_v25 = vmul.f32 %v2943_v56, %v2943_v56  ;;  %v2961_v21 = vsub.f32 %v2822_v33, %v2834_v63  ;;  %v870_v54 = vmul.f32 %v2949_v19, %v2949_v19  ;;  %v2967_v4 = vsub.f32 %v2826_v7, %v2834_v63 }
 0x357   :  { %v878_v41 = vadd.f32 %v877_v29, %v854_v10  ;;  %v871_v58 = vmul.f32 %v2955_v44, %v2955_v44  ;;  %v849_v10 = vsub.f32 %v2831_v50, %v2834_v63  ;;  %v1904_v50 = vld [vmem:[#allocation10 + $0x20] sm:$0xff] }
 0x358   :  { %v872_v29 = vmul.f32 %v2961_v21, %v2961_v21 }
 0x359   :  { %v879_v36 = vadd.f32 %v878_v41, %v855_v61  ;;  %v873_v61 = vmul.f32 %v2967_v4, %v2967_v4 }
 0x35b   :  { %v880_v47 = vadd.f32 %v879_v36, %v856_v30  ;;  %v1907_v30 = vld [vmem:[#allocation10 + $0x38] sm:$0xff]  ;;  %v874_v36 = vmul.f32 %v849_v10, %v849_v10 }
 0x35c   :  { %1131 = vmatpush.bf16.msra.mxu2 %v1907_v30 }
 0x35d   :  { %v881_v35 = vadd.f32 %v880_v47, %v857_v32  ;;  %v1906_v47 = vld [vmem:[#allocation10 + $0x30] sm:$0xff] }
 0x35f   :  { %v882_v26 = vadd.f32 %v881_v35, %v858_v52 }
 0x360   :  { %1132 = vmatpush.bf16.msra.mxu2 %v1906_v47 }
 0x361   :  { %v883_v6 = vadd.f32 %v882_v26, %v859_v37  ;;  %v1905_v37 = vld [vmem:[#allocation10 + $0x28] sm:$0xff] }
 0x363   :  { %v884_v24 = vadd.f32 %v883_v6, %v860_v46  ;;  %v1903_v6 = vld [vmem:[#allocation10 + $0x18] sm:$0xff] }
 0x364   :  { %1133 = vmatpush.bf16.msra.mxu2 %v1905_v37 }
 0x365   :  { %v885_v13 = vadd.f32 %v884_v24, %v861_v48 }
 0x367   :  { %v886_v62 = vadd.f32 %v885_v13, %v862_v38  ;;  %v1902_v38 = vld [vmem:[#allocation10 + $0x10] sm:$0xff] }
 0x368   :  { %1134 = vmatpush.bf16.msra.mxu2 %v1904_v50 }
 0x369   :  { %v887_v1 = vadd.f32 %v886_v62, %v863_v57  ;;  %v1901_v57 = vld [vmem:[#allocation10 + $0x8] sm:$0xff]  ;;  %v1900_v62 = vld [vmem:[#allocation10] sm:$0xff] }
 0x36b   :  { %v888_v3 = vadd.f32 %v887_v1, %v864_v8 }
 0x36c   :  { %1135 = vmatpush.bf16.msra.mxu2 %v1903_v6 }
 0x36d   :  { %v889_v18 = vadd.f32 %v888_v3, %v865_v40 }
 0x36f   :  { %v890_v14 = vadd.f32 %v889_v18, %v866_v43 }
 0x370   :  { %1136 = vmatpush.bf16.msra.mxu2 %v1902_v38 }
 0x371   :  { %v891_v59 = vadd.f32 %v890_v14, %v867_v39  ;;  %v2980_v39 = vld [vmem:[%s3637_s8] ss:$0 sm:$0xff]  ;;  %s1696_s8 = sshll.u32 %s3667_s21, 4  ;;  %s1697_s8 = int_to_ptr.hbm [resolvable:$true] %s1696_s8 }
 0x373   :  { %v892_v15 = vadd.f32 %v891_v59, %v868_v12 }
 0x374   :  { %1137 = vmatpush.bf16.msra.mxu2 %v1901_v57 }
 0x375   :  { %v893_v23 = vadd.f32 %v892_v15, %v869_v25  ;;  %v2992_v15 = vld [vmem:[%s3638_s9] ss:$0 sm:$0xff]  ;;  %s2239_s9 = smov [#allocation19]  }
 0x377   :  { %v894_v49 = vadd.f32 %v893_v23, %v870_v54 }
 0x378   :  { %1138 = vmatpush.bf16.msra.mxu2 %v1900_v62 }
 0x379   :  { %v895_v33 = vadd.f32 %v894_v49, %v871_v58 }
 0x37b   :  { %v896_v41 = vadd.f32 %v895_v33, %v872_v29 }
 0x37d   :  { %v897_v32 = vadd.f32 %v896_v41, %v873_v61 }
 0x37f   :  { %v898_v7 = vadd.f32 %v897_v32, %v874_v36 }
 0x381   :  { %v899_v52 = vrot.slane %v898_v7, 4 }
 0x383   :  { %v900_v35 = vadd.f32 %v899_v52, %v898_v7 }
 0x385   :  { %v901_v26 = vrot.slane %v900_v35, 2 }
 0x387   :  { %v902_v63 = vadd.f32 %v901_v26, %v900_v35 }
 0x389   :  { %v903_v46 = vrot.slane %v902_v63, 1 }
 0x38b   :  { %v904_v48 = vadd.f32 %v903_v46, %v902_v63 }
 0x38d   :  { %v905_v24 = vmul.f32 0.005, %v904_v48 }
 0x38f   :  { %v906_v13 = vadd.f32 1e-05, %v905_v24 }
 0x391   :  { %1943 = vrsqrt.f32 %v906_v13  ;;  %vm913_vm4 = vweird.f32 %v906_v13 }
 0x397   :  { %v1944_v8 = vpop.eup %1943 }
 0x398   :  { %v908_v1 = vmul.f32 %v1944_v8, %v906_v13  ;;  %vm914_vm3 = vweird.f32 %v1944_v8 }
 0x399   :  { %vm915_vm5 = vmor %vm913_vm4, %vm914_vm3 }
 0x39a   :  { %v909_v40 = vmul.f32 %v1944_v8, %v908_v1 }
 0x39c   :  { %v910_v3 = vmul.f32 0.5, %v909_v40 }
 0x39e   :  { %v911_v43 = vsub.f32 1.5, %v910_v3 }
 0x3a0   :  { %v912_v18 = vmul.f32 %v1944_v8, %v911_v43 }
 0x3a2   :  { %v2982_v14 = vsel %vm915_vm5, %v1944_v8, %v912_v18 }
 0x3a3   :  { %v941_v12 = vmul.f32 %v2982_v14, %v849_v10  ;;  %v917_v59 = vmul.f32 %v2982_v14, %v2838_v20  ;;  %v918_v25 = vmul.f32 %v2982_v14, %v2842_v22  ;;  %v919_v54 = vmul.f32 %v2982_v14, %v2846_v55 }
 0x3a4   :  { %v920_v23 = vmul.f32 %v2982_v14, %v2850_v5  ;;  %v3007_v29 = vmul.f32 %v2982_v14, %v2854_v28  ;;  %v3014_v61 = vmul.f32 %v2982_v14, %v2858_v60  ;;  %v3019_v30 = vmul.f32 %v2982_v14, %v2862_v17 }
 0x3a5   :  { %966 = vst [vmem:[#allocation14 + $0xc0] sm:$0xff] %v941_v12  ;;  %v2999_v58 = vmul.f32 %v2980_v39, %v941_v12  ;;  %v971_v20 = vmul.f32 %v2980_v39, %v917_v59  ;;  %v972_v49 = vmul.f32 %v2980_v39, %v918_v25  ;;  %v973_v22 = vmul.f32 %v2980_v39, %v919_v54 }
 0x3a6   :  { %942 = vst [vmem:[#allocation14] sm:$0xff] %v917_v59  ;;  %v974_v10 = vmul.f32 %v2980_v39, %v920_v23  ;;  %v3023_v32 = vmul.f32 %v2982_v14, %v2866_v31  ;;  %v925_v52 = vmul.f32 %v2982_v14, %v2870_v2  ;;  %v926_v17 = vmul.f32 %v2982_v14, %v2874_v0 }
 0x3a7   :  { %943 = vst [vmem:[#allocation14 + $0x8] sm:$0xff] %v918_v25  ;;  %v1000_v55 = vadd.f32 %v2992_v15, %v971_v20  ;;  %v1001_v5 = vadd.f32 %v2992_v15, %v972_v49  ;;  %v1002_v33 = vadd.f32 %v2992_v15, %v973_v22  ;;  %v927_v35 = vmul.f32 %v2982_v14, %v2877_v34 }
 0x3a8   :  { %944 = vst [vmem:[#allocation14 + $0x10] sm:$0xff] %v919_v54  ;;  %v1003_v41 = vadd.f32 %v2992_v15, %v974_v10  ;;  %v979_v31 = vmul.f32 %v2980_v39, %v925_v52  ;;  %v980_v37 = vmul.f32 %v2980_v39, %v926_v17  ;;  %v928_v26 = vmul.f32 %v2982_v14, %v2880_v45 }
 0x3a9   :  { %v1025_v28 = vmax.f32 %v1000_v55, 0.0  ;;  %v1026_v36 = vmax.f32 %v1001_v5, 0.0  ;;  %945 = vst [vmem:[#allocation14 + $0x18] sm:$0xff] %v920_v23  ;;  %v1027_v7 = vmax.f32 %v1002_v33, 0.0  ;;  %v981_v2 = vmul.f32 %v2980_v39, %v927_v35 }
 0x3aa   :  { %v1028_v47 = vmax.f32 %v1003_v41, 0.0  ;;  %946 = vst [vmem:[#allocation14 + $0x20] sm:$0xff] %v3007_v29  ;;  %v929_v0 = vmul.f32 %v2982_v14, %v2883_v11  ;;  %v930_v34 = vmul.f32 %v2982_v14, %v2886_v53  ;;  %v1008_v63 = vadd.f32 %v2992_v15, %v979_v31 }
 0x3ab   :  { %v1066_v60 = vpack.c.bf16 %v1026_v36, %v1025_v28  ;;  %947 = vst [vmem:[#allocation14 + $0x28] sm:$0xff] %v3014_v61  ;;  %v1009_v46 = vadd.f32 %v2992_v15, %v980_v37  ;;  %v982_v6 = vmul.f32 %v2980_v39, %v928_v26  ;;  %v931_v45 = vmul.f32 %v2982_v14, %v2889_v27 }
 0x3ac   :  { %948 = vst [vmem:[#allocation14 + $0x30] sm:$0xff] %v3019_v30  ;;  %v3039_v50 = vpack.c.bf16 %v1028_v47, %v1027_v7  ;;  %v1010_v48 = vadd.f32 %v2992_v15, %v981_v2  ;;  %v983_v24 = vmul.f32 %v2980_v39, %v929_v0  ;;  %v984_v11 = vmul.f32 %v2980_v39, %v930_v34 }
 0x3ad   :  { %1139 = vmatmul.bf16.vlgmr.msra.gmra.mxu2 %v1066_v60  ;;  %949 = vst [vmem:[#allocation14 + $0x38] sm:$0xff] %v3023_v32  ;;  %v932_v53 = vmul.f32 %v2982_v14, %v2919_v51  ;;  %v1033_v38 = vmax.f32 %v1008_v63, 0.0  ;;  %v1034_v13 = vmax.f32 %v1009_v46, 0.0  ;;  %v1011_v57 = vadd.f32 %v2992_v15, %v982_v6 }
 0x3ae   :  { %950 = vst [vmem:[#allocation14 + $0x40] sm:$0xff] %v925_v52  ;;  %v985_v62 = vmul.f32 %v2980_v39, %v931_v45  ;;  %v1035_v8 = vmax.f32 %v1010_v48, 0.0  ;;  %v1012_v27 = vadd.f32 %v2992_v15, %v983_v24  ;;  %v1013_v1 = vadd.f32 %v2992_v15, %v984_v11 }
 0x3af   :  { %951 = vst [vmem:[#allocation14 + $0x48] sm:$0xff] %v926_v17  ;;  %v986_v40 = vmul.f32 %v2980_v39, %v932_v53  ;;  %v3061_v3 = vpack.c.bf16 %v1034_v13, %v1033_v38  ;;  %v1036_v43 = vmax.f32 %v1011_v57, 0.0  ;;  %v933_v18 = vmul.f32 %v2982_v14, %v2925_v9 }
 0x3b0   :  { %952 = vst [vmem:[#allocation14 + $0x50] sm:$0xff] %v927_v35  ;;  %v1014_v51 = vadd.f32 %v2992_v15, %v985_v62  ;;  %v1037_v12 = vmax.f32 %v1012_v27, 0.0  ;;  %v1038_v59 = vmax.f32 %v1013_v1, 0.0  ;;  %v934_v54 = vmul.f32 %v2982_v14, %v2931_v42 }
 0x3b1   :  { %953 = vst [vmem:[#allocation14 + $0x58] sm:$0xff] %v928_v26  ;;  %v1015_v25 = vadd.f32 %v2992_v15, %v986_v40  ;;  %v3069_v23 = vpack.c.bf16 %v1036_v43, %v1035_v8  ;;  %v987_v49 = vmul.f32 %v2980_v39, %v933_v18  ;;  %v935_v22 = vmul.f32 %v2982_v14, %v2937_v16 }
 0x3b2   :  { %954 = vst [vmem:[#allocation14 + $0x60] sm:$0xff] %v929_v0  ;;  %v1039_v20 = vmax.f32 %v1014_v51, 0.0  ;;  %v1072_v10 = vpack.c.bf16 %v1038_v59, %v1037_v12  ;;  %v988_v9 = vmul.f32 %v2980_v39, %v934_v54  ;;  %v936_v5 = vmul.f32 %v2982_v14, %v2943_v56 }
 0x3b3   :  { %955 = vst [vmem:[#allocation14 + $0x68] sm:$0xff] %v930_v34  ;;  %v1040_v55 = vmax.f32 %v1015_v25, 0.0  ;;  %v1016_v42 = vadd.f32 %v2992_v15, %v987_v49  ;;  %v989_v33 = vmul.f32 %v2980_v39, %v935_v22  ;;  %v937_v41 = vmul.f32 %v2982_v14, %v2949_v19 }
 0x3b4   :  { %956 = vst [vmem:[#allocation14 + $0x70] sm:$0xff] %v931_v45  ;;  %v938_v28 = vmul.f32 %v2982_v14, %v2955_v44  ;;  %v1017_v36 = vadd.f32 %v2992_v15, %v988_v9  ;;  %v990_v7 = vmul.f32 %v2980_v39, %v936_v5  ;;  %v939_v56 = vmul.f32 %v2982_v14, %v2961_v21 }
 0x3b5   :  { %957 = vst [vmem:[#allocation14 + $0x78] sm:$0xff] %v932_v53  ;;  %v1073_v16 = vpack.c.bf16 %v1040_v55, %v1039_v20  ;;  %v1041_v47 = vmax.f32 %v1016_v42, 0.0  ;;  %v1018_v60 = vadd.f32 %v2992_v15, %v989_v33  ;;  %v991_v52 = vmul.f32 %v2980_v39, %v937_v41 }
 0x3b6   :  { %958 = vst [vmem:[#allocation14 + $0x80] sm:$0xff] %v933_v18  ;;  %v992_v19 = vmul.f32 %v2980_v39, %v938_v28  ;;  %v1042_v17 = vmax.f32 %v1017_v36, 0.0  ;;  %v1019_v44 = vadd.f32 %v2992_v15, %v990_v7  ;;  %v940_v35 = vmul.f32 %v2982_v14, %v2967_v4 }
 0x3b7   :  { %959 = vst [vmem:[#allocation14 + $0x88] sm:$0xff] %v934_v54  ;;  %v993_v31 = vmul.f32 %v2980_v39, %v939_v56  ;;  %v1043_v37 = vmax.f32 %v1018_v60, 0.0  ;;  %v1020_v21 = vadd.f32 %v2992_v15, %v991_v52  ;;  %v3098_v2 = vadd.f32 %v2992_v15, %v2999_v58 }
 0x3b8   :  { %960 = vst [vmem:[#allocation14 + $0x90] sm:$0xff] %v935_v22  ;;  %v1021_v26 = vadd.f32 %v2992_v15, %v992_v19  ;;  %v1074_v0 = vpack.c.bf16 %v1042_v17, %v1041_v47  ;;  %v1044_v34 = vmax.f32 %v1019_v44, 0.0  ;;  %v994_v63 = vmul.f32 %v2980_v39, %v940_v35 }
 0x3b9   :  { %961 = vst [vmem:[#allocation14 + $0x98] sm:$0xff] %v936_v5  ;;  %v1022_v46 = vadd.f32 %v2992_v15, %v993_v31  ;;  %v1045_v4 = vmax.f32 %v1020_v21, 0.0  ;;  %v975_v58 = vmul.f32 %v2980_v39, %v3007_v29  ;;  %v976_v24 = vmul.f32 %v2980_v39, %v3014_v61 }
 0x3ba   :  { %962 = vst [vmem:[#allocation14 + $0xa0] sm:$0xff] %v937_v41  ;;  %v1046_v14 = vmax.f32 %v1021_v26, 0.0  ;;  %v1075_v6 = vpack.c.bf16 %v1044_v34, %v1043_v37  ;;  %v1023_v45 = vadd.f32 %v2992_v15, %v994_v63  ;;  %v977_v27 = vmul.f32 %v2980_v39, %v3019_v30 }
 0x3bb   :  { %963 = vst [vmem:[#allocation14 + $0xa8] sm:$0xff] %v938_v28  ;;  %v1047_v48 = vmax.f32 %v1022_v46, 0.0  ;;  %v1004_v13 = vadd.f32 %v2992_v15, %v975_v58  ;;  %v978_v29 = vmul.f32 %v2980_v39, %v3023_v32  ;;  %v3121_v39 = vld [vmem:[%s3640_s11] ss:$0 sm:$0xff]  ;;  %v1049_v28 = vmax.f32 %v3098_v2, 0.0  ;;  %s1720_s11 = sshll.u32 %s2239_s9, 4  ;;  %s1721_s11 = int_to_ptr.vmem [resolvable:$true] %s1720_s11 }
 0x3bc   :  { %964 = vst [vmem:[#allocation14 + $0xb0] sm:$0xff] %v939_v56  ;;  %v1076_v11 = vpack.c.bf16 %v1046_v14, %v1045_v4  ;;  %v1048_v53 = vmax.f32 %v1023_v45, 0.0  ;;  %v1006_v1 = vadd.f32 %v2992_v15, %v977_v27 }
 0x3bd   :  { %1144 = vmatmul.bf16.gmra.mxu2 %v3039_v50  ;;  %965 = vst [vmem:[#allocation14 + $0xb8] sm:$0xff] %v940_v35  ;;  %v1005_v50 = vadd.f32 %v2992_v15, %v976_v24  ;;  %v1029_v57 = vmax.f32 %v1004_v13, 0.0  ;;  %v1007_v61 = vadd.f32 %v2992_v15, %v978_v29  ;;  %v1078_v56 = vpack.c.bf16 %v1049_v28, %v1049_v28 }
 0x3be   :  { %v1077_v38 = vpack.c.bf16 %v1048_v53, %v1047_v48  ;;  %v1031_v40 = vmax.f32 %v1006_v1, 0.0  ;;  %1689 = dma.vmem_to_hbm [thread:$0]  %s1682_s3, 3200, %s1684_s30, [#allocation15], %s3663_s6, %s3663_s6, %s2227_s26  }
 0x3bf   :  { %v1030_v62 = vmax.f32 %v1005_v50, 0.0  ;;  %v1032_v43 = vmax.f32 %v1007_v61, 0.0 }
 0x3c1   :  { %v1068_v8 = vpack.c.bf16 %v1030_v62, %v1029_v57  ;;  %v1069_v51 = vpack.c.bf16 %v1032_v43, %v1031_v40 }
 0x3cd   :  { %1149 = vmatmul.bf16.gmra.mxu2 %v1068_v8 }
 0x3dd   :  { %1154 = vmatmul.bf16.gmra.mxu2 %v1069_v51 }
 0x3ed   :  { %1159 = vmatmul.bf16.gmra.mxu2 %v3061_v3 }
 0x3fd   :  { %1164 = vmatmul.bf16.gmra.mxu2 %v3069_v23 }
 0x40d   :  { %1169 = vmatmul.bf16.gmra.mxu2 %v1072_v10 }
 0x41d   :  { %1174 = vmatmul.bf16.gmra.mxu2 %v1073_v16 }
 0x42d   :  { %1179 = vmatmul.bf16.gmra.mxu2 %v1074_v0 }
 0x430   :  { %v1140_v18 = vpop.f32.mrf.mxu2 }
 0x431   :  { %v3124_v15 = vadd.f32 %v3121_v39, %v1140_v18 }
 0x438   :  { %v1142_v30 = vpop.f32.mrf.mxu2 }
 0x439   :  { %v3127_v32 = vadd.f32 %v3121_v39, %v1142_v30 }
 0x43b   :  { %v1204_v3 = vadd.f32 %v3127_v32, %v3124_v15 }
 0x43d   :  { %1184 = vmatmul.bf16.gmra.mxu2 %v1075_v6 }
 0x440   :  { %v1145_v12 = vpop.f32.mrf.mxu2 }
 0x441   :  { %v3132_v59 = vadd.f32 %v3121_v39, %v1145_v12 }
 0x443   :  { %v1205_v25 = vadd.f32 %v1204_v3, %v3132_v59 }
 0x448   :  { %v1147_v54 = vpop.f32.mrf.mxu2 }
 0x449   :  { %v3136_v23 = vadd.f32 %v3121_v39, %v1147_v54 }
 0x44b   :  { %v1206_v20 = vadd.f32 %v1205_v25, %v3136_v23 }
 0x44d   :  { %1189 = vmatmul.bf16.gmra.mxu2 %v1076_v11 }
 0x450   :  { %v1150_v49 = vpop.f32.mrf.mxu2 }
 0x451   :  { %v3140_v22 = vadd.f32 %v3121_v39, %v1150_v49 }
 0x453   :  { %v1207_v10 = vadd.f32 %v1206_v20, %v3140_v22 }
 0x458   :  { %v1152_v55 = vpop.f32.mrf.mxu2 }
 0x459   :  { %v3144_v9 = vadd.f32 %v3121_v39, %v1152_v55 }
 0x45b   :  { %v1208_v5 = vadd.f32 %v1207_v10, %v3144_v9 }
 0x45d   :  { %1194 = vmatmul.bf16.gmra.mxu2 %v1077_v38 }
 0x460   :  { %v1155_v42 = vpop.f32.mrf.mxu2 }
 0x461   :  { %v3148_v33 = vadd.f32 %v3121_v39, %v1155_v42 }
 0x463   :  { %v1209_v41 = vadd.f32 %v1208_v5, %v3148_v33 }
 0x468   :  { %v1157_v16 = vpop.f32.mrf.mxu2 }
 0x469   :  { %v3153_v36 = vadd.f32 %v3121_v39, %v1157_v16 }
 0x46b   :  { %v1210_v7 = vadd.f32 %v1209_v41, %v3153_v36 }
 0x46d   :  { %1199 = vmatmul.bf16.gmra.mxu2 %v1078_v56 }
 0x470   :  { %v1160_v47 = vpop.f32.mrf.mxu2 }
 0x471   :  { %v3157_v60 = vadd.f32 %v3121_v39, %v1160_v47 }
 0x473   :  { %v1211_v52 = vadd.f32 %v1210_v7, %v3157_v60 }
 0x478   :  { %v1162_v19 = vpop.f32.mrf.mxu2 }
 0x479   :  { %v3161_v17 = vadd.f32 %v3121_v39, %v1162_v19 }
 0x47b   :  { %v1212_v44 = vadd.f32 %v1211_v52, %v3161_v17 }
 0x480   :  { %v1165_v35 = vpop.f32.mrf.mxu2 }
 0x481   :  { %v1166_v31 = vadd.f32 %v3121_v39, %v1165_v35 }
 0x483   :  { %v1213_v37 = vadd.f32 %v1212_v44, %v1166_v31 }
 0x488   :  { %v1167_v21 = vpop.f32.mrf.mxu2 }
 0x489   :  { %v1168_v26 = vadd.f32 %v3121_v39, %v1167_v21 }
 0x48b   :  { %v1214_v2 = vadd.f32 %v1213_v37, %v1168_v26 }
 0x490   :  { %v1170_v0 = vpop.f32.mrf.mxu2 }
 0x491   :  { %v1171_v34 = vadd.f32 %v3121_v39, %v1170_v0 }
 0x493   :  { %v1215_v63 = vadd.f32 %v1214_v2, %v1171_v34 }
 0x498   :  { %v1172_v46 = vpop.f32.mrf.mxu2 }
 0x499   :  { %v1173_v4 = vadd.f32 %v3121_v39, %v1172_v46 }
 0x49b   :  { %v1216_v14 = vadd.f32 %v1215_v63, %v1173_v4 }
 0x4a0   :  { %v1175_v6 = vpop.f32.mrf.mxu2 }
 0x4a1   :  { %v1176_v45 = vadd.f32 %v3121_v39, %v1175_v6 }
 0x4a3   :  { %v1217_v48 = vadd.f32 %v1216_v14, %v1176_v45 }
 0x4a8   :  { %v1177_v58 = vpop.f32.mrf.mxu2 }
 0x4a9   :  { %v3170_v57 = vadd.f32 %v3121_v39, %v1177_v58 }
 0x4ab   :  { %v1218_v27 = vadd.f32 %v1217_v48, %v3170_v57 }
 0x4b0   :  { %v1180_v24 = vpop.f32.mrf.mxu2 }
 0x4b1   :  { %v3173_v62 = vadd.f32 %v3121_v39, %v1180_v24 }
 0x4b3   :  { %v1219_v1 = vadd.f32 %v1218_v27, %v3173_v62 }
 0x4b8   :  { %v1182_v11 = vpop.f32.mrf.mxu2 }
 0x4b9   :  { %v3177_v29 = vadd.f32 %v3121_v39, %v1182_v11 }
 0x4bb   :  { %v1220_v40 = vadd.f32 %v1219_v1, %v3177_v29 }
 0x4c0   :  { %v1185_v53 = vpop.f32.mrf.mxu2 }
 0x4c1   :  { %v3181_v61 = vadd.f32 %v3121_v39, %v1185_v53 }
 0x4c3   :  { %v1221_v51 = vadd.f32 %v1220_v40, %v3181_v61 }
 0x4c8   :  { %v1187_v38 = vpop.f32.mrf.mxu2 }
 0x4c9   :  { %v3185_v43 = vadd.f32 %v3121_v39, %v1187_v38 }
 0x4cb   :  { %v1222_v3 = vadd.f32 %v1221_v51, %v3185_v43 }
 0x4d0   :  { %v1190_v13 = vpop.f32.mrf.mxu2 }
 0x4d1   :  { %v3189_v18 = vadd.f32 %v3121_v39, %v1190_v13 }
 0x4d3   :  { %v1223_v25 = vadd.f32 %v1222_v3, %v3189_v18 }
 0x4d8   :  { %v1192_v50 = vpop.f32.mrf.mxu2 }
 0x4d9   :  { %v3193_v12 = vadd.f32 %v3121_v39, %v1192_v50 }
 0x4db   :  { %v1224_v20 = vadd.f32 %v1223_v25, %v3193_v12 }
 0x4e0   :  { %v1195_v8 = vpop.f32.mrf.mxu2 }
 0x4e1   :  { %v3197_v54 = vadd.f32 %v3121_v39, %v1195_v8 }
 0x4e3   :  { %v1225_v10 = vadd.f32 %v1224_v20, %v3197_v54 }
 0x4e8   :  { %v1197_v30 = vpop.f32.mrf.mxu2 }
 0x4e9   :  { %v3201_v49 = vadd.f32 %v3121_v39, %v1197_v30 }
 0x4eb   :  { %v1226_v5 = vadd.f32 %v1225_v10, %v3201_v49 }
 0x4f0   :  { %v1200_v55 = vpop.f32.mrf.mxu2 }
 0x4f1   :  { %v3206_v42 = vadd.f32 %v3121_v39, %v1200_v55 }
 0x4f3   :  { %v1227_v41 = vadd.f32 %v1226_v5, %v3206_v42 }
 0x4f5   :  { %v1228_v28 = vrot.slane %v1227_v41, 4 }
 0x4f7   :  { %v1229_v16 = vadd.f32 %v1228_v28, %v1227_v41 }
 0x4f8   :  { %v1202_v7 = vpop.f32.mrf.mxu2 }
 0x4f9   :  { %v1230_v56 = vrot.slane %v1229_v16, 2 }
 0x4fb   :  { %v1231_v47 = vadd.f32 %v1230_v56, %v1229_v16 }
 0x4fd   :  { %v1232_v52 = vrot.slane %v1231_v47, 1 }
 0x4ff   :  { %v1233_v19 = vadd.f32 %v1232_v52, %v1231_v47 }
 0x501   :  { %v3209_v44 = vmul.f32 0.005, %v1233_v19 }
 0x503   :  { %v3213_v35 = vsub.f32 %v3124_v15, %v3209_v44  ;;  %v3217_v37 = vsub.f32 %v3127_v32, %v3209_v44  ;;  %v3221_v39 = vsub.f32 %v3132_v59, %v3209_v44  ;;  %v3225_v21 = vsub.f32 %v3136_v23, %v3209_v44 }
 0x504   :  { %v3229_v2 = vsub.f32 %v3140_v22, %v3209_v44  ;;  %v3233_v15 = vsub.f32 %v3144_v9, %v3209_v44  ;;  %v3237_v32 = vsub.f32 %v3148_v33, %v3209_v44  ;;  %v3241_v59 = vsub.f32 %v3153_v36, %v3209_v44 }
 0x505   :  { %v3245_v23 = vsub.f32 %v3157_v60, %v3209_v44  ;;  %v3249_v22 = vsub.f32 %v3161_v17, %v3209_v44  ;;  %v3252_v0 = vsub.f32 %v1166_v31, %v3209_v44  ;;  %v3255_v9 = vsub.f32 %v1168_v26, %v3209_v44 }
 0x506   :  { %v3258_v33 = vsub.f32 %v1171_v34, %v3209_v44  ;;  %v3261_v36 = vsub.f32 %v1173_v4, %v3209_v44  ;;  %v3264_v63 = vsub.f32 %v1176_v45, %v3209_v44  ;;  %v1260_v60 = vmul.f32 %v3213_v35, %v3213_v35 }
 0x507   :  { %v1261_v17 = vmul.f32 %v3217_v37, %v3217_v37  ;;  %v1262_v31 = vmul.f32 %v3221_v39, %v3221_v39  ;;  %v1263_v34 = vmul.f32 %v3225_v21, %v3225_v21  ;;  %v1264_v4 = vmul.f32 %v3229_v2, %v3229_v2 }
 0x508   :  { %v1265_v6 = vmul.f32 %v3233_v15, %v3233_v15  ;;  %v1266_v48 = vmul.f32 %v3237_v32, %v3237_v32  ;;  %v1267_v24 = vmul.f32 %v3241_v59, %v3241_v59  ;;  %v1268_v53 = vmul.f32 %v3245_v23, %v3245_v23 }
 0x509   :  { %v1285_v26 = vadd.f32 %v1261_v17, %v1260_v60  ;;  %v1269_v13 = vmul.f32 %v3249_v22, %v3249_v22  ;;  %v1270_v8 = vmul.f32 %v3252_v0, %v3252_v0  ;;  %v1271_v1 = vmul.f32 %v3255_v9, %v3255_v9 }
 0x50a   :  { %v1272_v51 = vmul.f32 %v3258_v33, %v3258_v33  ;;  %v3294_v3 = vsub.f32 %v3170_v57, %v3209_v44  ;;  %v1273_v25 = vmul.f32 %v3261_v36, %v3261_v36  ;;  %v3300_v10 = vsub.f32 %v3173_v62, %v3209_v44 }
 0x50b   :  { %v1286_v46 = vadd.f32 %v1285_v26, %v1262_v31  ;;  %v1274_v55 = vmul.f32 %v3264_v63, %v3264_v63  ;;  %v3306_v41 = vsub.f32 %v3177_v29, %v3209_v44  ;;  %v3312_v16 = vsub.f32 %v3181_v61, %v3209_v44 }
 0x50c   :  { %v1275_v57 = vmul.f32 %v3294_v3, %v3294_v3  ;;  %v1276_v62 = vmul.f32 %v3300_v10, %v3300_v10  ;;  %v3318_v56 = vsub.f32 %v3185_v43, %v3209_v44  ;;  %v3324_v52 = vsub.f32 %v3189_v18, %v3209_v44 }
 0x50d   :  { %v1287_v14 = vadd.f32 %v1286_v46, %v1263_v34  ;;  %v1277_v29 = vmul.f32 %v3306_v41, %v3306_v41  ;;  %v1278_v61 = vmul.f32 %v3312_v16, %v3312_v16  ;;  %v3330_v60 = vsub.f32 %v3193_v12, %v3209_v44 }
 0x50e   :  { %v1279_v43 = vmul.f32 %v3318_v56, %v3318_v56  ;;  %v3336_v31 = vsub.f32 %v3197_v54, %v3209_v44  ;;  %v1280_v18 = vmul.f32 %v3324_v52, %v3324_v52  ;;  %v3342_v34 = vsub.f32 %v3201_v49, %v3209_v44 }
 0x50f   :  { %v1288_v45 = vadd.f32 %v1287_v14, %v1264_v4  ;;  %v1281_v12 = vmul.f32 %v3330_v60, %v3330_v60  ;;  %v1259_v4 = vsub.f32 %v3206_v42, %v3209_v44  ;;  %v1912_v42 = vld [vmem:[#allocation11 + $0x20] sm:$0xff] }
 0x510   :  { %v1282_v14 = vmul.f32 %v3336_v31, %v3336_v31 }
 0x511   :  { %v1289_v58 = vadd.f32 %v1288_v45, %v1265_v6  ;;  %v1283_v6 = vmul.f32 %v3342_v34, %v3342_v34 }
 0x513   :  { %v1290_v11 = vadd.f32 %v1289_v58, %v1266_v48  ;;  %v1915_v48 = vld [vmem:[#allocation11 + $0x38] sm:$0xff]  ;;  %v1284_v58 = vmul.f32 %v1259_v4, %v1259_v4 }
 0x514   :  { %1566 = vmatpush.bf16.msra.mxu3 %v1915_v48 }
 0x515   :  { %v1291_v38 = vadd.f32 %v1290_v11, %v1267_v24  ;;  %v1914_v11 = vld [vmem:[#allocation11 + $0x30] sm:$0xff] }
 0x517   :  { %v1292_v50 = vadd.f32 %v1291_v38, %v1268_v53 }
 0x518   :  { %1567 = vmatpush.bf16.msra.mxu3 %v1914_v11 }
 0x519   :  { %v1293_v27 = vadd.f32 %v1292_v50, %v1269_v13  ;;  %v1913_v13 = vld [vmem:[#allocation11 + $0x28] sm:$0xff] }
 0x51b   :  { %v1294_v40 = vadd.f32 %v1293_v27, %v1270_v8  ;;  %v1911_v27 = vld [vmem:[#allocation11 + $0x18] sm:$0xff] }
 0x51c   :  { %1568 = vmatpush.bf16.msra.mxu3 %v1913_v13 }
 0x51d   :  { %v1295_v30 = vadd.f32 %v1294_v40, %v1271_v1 }
 0x51f   :  { %v1296_v20 = vadd.f32 %v1295_v30, %v1272_v51  ;;  %v1910_v51 = vld [vmem:[#allocation11 + $0x10] sm:$0xff] }
 0x520   :  { %1569 = vmatpush.bf16.msra.mxu3 %v1912_v42 }
 0x521   :  { %v1297_v5 = vadd.f32 %v1296_v20, %v1273_v25  ;;  %v1909_v25 = vld [vmem:[#allocation11 + $0x8] sm:$0xff]  ;;  %v1908_v20 = vld [vmem:[#allocation11] sm:$0xff] }
 0x523   :  { %v1298_v28 = vadd.f32 %v1297_v5, %v1274_v55 }
 0x524   :  { %1570 = vmatpush.bf16.msra.mxu3 %v1911_v27 }
 0x525   :  { %v1299_v7 = vadd.f32 %v1298_v28, %v1275_v57 }
 0x527   :  { %v1300_v47 = vadd.f32 %v1299_v7, %v1276_v62 }
 0x528   :  { %1571 = vmatpush.bf16.msra.mxu3 %v1910_v51 }
 0x529   :  { %v1301_v19 = vadd.f32 %v1300_v47, %v1277_v29  ;;  %v3355_v29 = vld [vmem:[%s3641_s12] ss:$0 sm:$0xff]  ;;  %s1722_s12 = sshll.u32 %s3668_s16, 4  ;;  %s1723_s12 = int_to_ptr.hbm [resolvable:$true] %s1722_s12 }
 0x52b   :  { %v1302_v17 = vadd.f32 %v1301_v19, %v1278_v61 }
 0x52c   :  { %1572 = vmatpush.bf16.msra.mxu3 %v1909_v25 }
 0x52d   :  { %v1303_v26 = vadd.f32 %v1302_v17, %v1279_v43  ;;  %v3369_v17 = vld [vmem:[%s3642_s13] ss:$0 sm:$0xff] }
 0x52f   :  { %v1304_v46 = vadd.f32 %v1303_v26, %v1280_v18 }
 0x530   :  { %1573 = vmatpush.bf16.msra.mxu3 %v1908_v20 }
 0x531   :  { %v1305_v54 = vadd.f32 %v1304_v46, %v1281_v12 }
 0x533   :  { %v1306_v45 = vadd.f32 %v1305_v54, %v1282_v14 }
 0x535   :  { %v1307_v24 = vadd.f32 %v1306_v45, %v1283_v6 }
 0x537   :  { %v1308_v49 = vadd.f32 %v1307_v24, %v1284_v58 }
 0x539   :  { %v1309_v53 = vrot.slane %v1308_v49, 4 }
 0x53b   :  { %v1310_v38 = vadd.f32 %v1309_v53, %v1308_v49 }
 0x53d   :  { %v1311_v50 = vrot.slane %v1310_v38, 2 }
 0x53f   :  { %v1312_v44 = vadd.f32 %v1311_v50, %v1310_v38 }
 0x541   :  { %v1313_v8 = vrot.slane %v1312_v44, 1 }
 0x543   :  { %v1314_v1 = vadd.f32 %v1313_v8, %v1312_v44 }
 0x545   :  { %v1315_v40 = vmul.f32 0.005, %v1314_v1 }
 0x547   :  { %v1316_v30 = vadd.f32 1e-05, %v1315_v40 }
 0x549   :  { %1945 = vrsqrt.f32 %v1316_v30  ;;  %vm1323_vm7 = vweird.f32 %v1316_v30 }
 0x54f   :  { %v1946_v55 = vpop.eup %1945 }
 0x550   :  { %v1318_v5 = vmul.f32 %v1946_v55, %v1316_v30  ;;  %vm1324_vm6 = vweird.f32 %v1946_v55 }
 0x551   :  { %vm1325_vm8 = vmor %vm1323_vm7, %vm1324_vm6 }
 0x552   :  { %v1319_v57 = vmul.f32 %v1946_v55, %v1318_v5 }
 0x554   :  { %v1320_v28 = vmul.f32 0.5, %v1319_v57 }
 0x556   :  { %v1321_v62 = vsub.f32 1.5, %v1320_v28 }
 0x558   :  { %v1322_v7 = vmul.f32 %v1946_v55, %v1321_v62 }
 0x55a   :  { %v3357_v47 = vsel %vm1325_vm8, %v1946_v55, %v1322_v7 }
 0x55b   :  { %v3360_v61 = vmul.f32 %v3357_v47, %v1259_v4  ;;  %v1327_v19 = vmul.f32 %v3357_v47, %v3213_v35  ;;  %v1328_v43 = vmul.f32 %v3357_v47, %v3217_v37  ;;  %v1329_v18 = vmul.f32 %v3357_v47, %v3221_v39 }
 0x55c   :  { %v1330_v26 = vmul.f32 %v3357_v47, %v3225_v21  ;;  %v1331_v12 = vmul.f32 %v3357_v47, %v3229_v2  ;;  %v1332_v35 = vmul.f32 %v3357_v47, %v3233_v15  ;;  %v1333_v37 = vmul.f32 %v3357_v47, %v3237_v32 }
 0x55d   :  { %1376 = vst [vmem:[#allocation16 + $0xc0] sm:$0xff] %v3360_v61  ;;  %v1381_v46 = vmul.f32 %v3355_v29, %v1327_v19  ;;  %v1382_v4 = vmul.f32 %v3355_v29, %v1328_v43  ;;  %v1383_v39 = vmul.f32 %v3355_v29, %v1329_v18  ;;  %v1334_v15 = vmul.f32 %v3357_v47, %v3241_v59 }
 0x55e   :  { %1352 = vst [vmem:[#allocation16] sm:$0xff] %v1327_v19  ;;  %v1384_v21 = vmul.f32 %v3355_v29, %v1330_v26  ;;  %v1385_v14 = vmul.f32 %v3355_v29, %v1331_v12  ;;  %v1386_v2 = vmul.f32 %v3355_v29, %v1332_v35  ;;  %v1387_v45 = vmul.f32 %v3355_v29, %v1333_v37 }
 0x55f   :  { %1353 = vst [vmem:[#allocation16 + $0x8] sm:$0xff] %v1328_v43  ;;  %v1410_v32 = vadd.f32 %v3369_v17, %v1381_v46  ;;  %v1411_v54 = vadd.f32 %v3369_v17, %v1382_v4  ;;  %v3393_v6 = vadd.f32 %v3369_v17, %v1383_v39  ;;  %v1388_v24 = vmul.f32 %v3355_v29, %v1334_v15 }
 0x560   :  { %1354 = vst [vmem:[#allocation16 + $0x10] sm:$0xff] %v1329_v18  ;;  %v3397_v48 = vadd.f32 %v3369_v17, %v1384_v21  ;;  %v3400_v58 = vadd.f32 %v3369_v17, %v1385_v14  ;;  %v3405_v53 = vadd.f32 %v3369_v17, %v1386_v2  ;;  %v3409_v13 = vadd.f32 %v3369_v17, %v1387_v45 }
 0x561   :  { %v1435_v59 = vmax.f32 %v1410_v32, 0.0  ;;  %v1436_v49 = vmax.f32 %v1411_v54, 0.0  ;;  %1355 = vst [vmem:[#allocation16 + $0x18] sm:$0xff] %v1330_v26  ;;  %v1437_v11 = vmax.f32 %v3393_v6, 0.0  ;;  %v1335_v42 = vmul.f32 %v3357_v47, %v3245_v23 }
 0x562   :  { %v1438_v38 = vmax.f32 %v3397_v48, 0.0  ;;  %1356 = vst [vmem:[#allocation16 + $0x20] sm:$0xff] %v1331_v12  ;;  %v1336_v44 = vmul.f32 %v3357_v47, %v3249_v22  ;;  %v1439_v8 = vmax.f32 %v3400_v58, 0.0  ;;  %v3417_v27 = vadd.f32 %v3369_v17, %v1388_v24 }
 0x563   :  { %1460 = vst [vmem:[#allocation17] sm:$0xff] %v1435_v59  ;;  %v1501_v50 = vpack.c.bf16 %v1436_v49, %v1435_v59  ;;  %v3421_v1 = vmul.f32 %v3357_v47, %v3252_v0  ;;  %v1440_v40 = vmax.f32 %v3405_v53, 0.0  ;;  %v1389_v23 = vmul.f32 %v3355_v29, %v1335_v42 }
 0x564   :  { %1461 = vst [vmem:[#allocation17 + $0x8] sm:$0xff] %v1436_v49  ;;  %v1390_v22 = vmul.f32 %v3355_v29, %v1336_v44  ;;  %v3430_v51 = vmul.f32 %v3357_v47, %v3255_v9  ;;  %v1441_v0 = vmax.f32 %v3409_v13, 0.0  ;;  %v3439_v25 = vmul.f32 %v3357_v47, %v3258_v33 }
 0x565   :  { %1574 = vmatmul.bf16.vlgmr.msra.gmra.mxu3 %v1501_v50  ;;  %1462 = vst [vmem:[#allocation17 + $0x10] sm:$0xff] %v1437_v11  ;;  %v1391_v30 = vmul.f32 %v3355_v29, %v3421_v1  ;;  %v3443_v20 = vmul.f32 %v3357_v47, %v3261_v36  ;;  %v3446_v9 = vadd.f32 %v3369_v17, %v1389_v23 }
 0x566   :  { %1463 = vst [vmem:[#allocation17 + $0x18] sm:$0xff] %v1438_v38  ;;  %v3449_v55 = vadd.f32 %v3369_v17, %v1390_v22  ;;  %v1392_v5 = vmul.f32 %v3355_v29, %v3430_v51  ;;  %v3455_v57 = vmul.f32 %v3357_v47, %v3264_v63  ;;  %v1393_v36 = vmul.f32 %v3355_v29, %v3439_v25 }
 0x567   :  { %1357 = vst [vmem:[#allocation16 + $0x28] sm:$0xff] %v1332_v35  ;;  %v1420_v33 = vadd.f32 %v3369_v17, %v1391_v30  ;;  %v1394_v28 = vmul.f32 %v3355_v29, %v3443_v20  ;;  %v3466_v62 = vmul.f32 %v3357_v47, %v3294_v3  ;;  %v1442_v63 = vmax.f32 %v3417_v27, 0.0 }
 0x568   :  { %1464 = vst [vmem:[#allocation17 + $0x20] sm:$0xff] %v1439_v8  ;;  %v1443_v7 = vmax.f32 %v3446_v9, 0.0  ;;  %v1421_v19 = vadd.f32 %v3369_v17, %v1392_v5  ;;  %v1395_v43 = vmul.f32 %v3355_v29, %v3455_v57  ;;  %v3476_v26 = vadd.f32 %v3369_v17, %v1393_v36 }
 0x569   :  { %1465 = vst [vmem:[#allocation17 + $0x28] sm:$0xff] %v1440_v40  ;;  %v1445_v18 = vmax.f32 %v1420_v33, 0.0  ;;  %v3479_v3 = vadd.f32 %v3369_v17, %v1394_v28  ;;  %v1396_v12 = vmul.f32 %v3355_v29, %v3466_v62  ;;  %v1444_v35 = vmax.f32 %v3449_v55, 0.0 }
 0x56a   :  { %1358 = vst [vmem:[#allocation16 + $0x30] sm:$0xff] %v1333_v37  ;;  %v1446_v46 = vmax.f32 %v1421_v19, 0.0  ;;  %v3485_v4 = vadd.f32 %v3369_v17, %v1395_v43  ;;  %v3489_v37 = vmul.f32 %v3357_v47, %v3300_v10  ;;  %v1447_v39 = vmax.f32 %v3476_v26, 0.0 }
 0x56b   :  { %1359 = vst [vmem:[#allocation16 + $0x38] sm:$0xff] %v1334_v15  ;;  %v1448_v21 = vmax.f32 %v3479_v3, 0.0  ;;  %v1425_v14 = vadd.f32 %v3369_v17, %v1396_v12  ;;  %v1344_v2 = vmul.f32 %v3357_v47, %v3306_v41  ;;  %v1345_v54 = vmul.f32 %v3357_v47, %v3312_v16 }
 0x56c   :  { %1466 = vst [vmem:[#allocation17 + $0x30] sm:$0xff] %v1441_v0  ;;  %v3500_v15 = vpack.c.bf16 %v1446_v46, %v1445_v18  ;;  %v1449_v10 = vmax.f32 %v3485_v4, 0.0  ;;  %v1397_v32 = vmul.f32 %v3355_v29, %v3489_v37  ;;  %v1346_v41 = vmul.f32 %v3357_v47, %v3318_v56 }
 0x56d   :  { %1467 = vst [vmem:[#allocation17 + $0x38] sm:$0xff] %v1442_v63  ;;  %v3507_v45 = vpack.c.bf16 %v1448_v21, %v1447_v39  ;;  %v1450_v24 = vmax.f32 %v1425_v14, 0.0  ;;  %v1398_v59 = vmul.f32 %v3355_v29, %v1344_v2  ;;  %v1399_v50 = vmul.f32 %v3355_v29, %v1345_v54 }
 0x56e   :  { %1360 = vst [vmem:[#allocation16 + $0x40] sm:$0xff] %v1335_v42  ;;  %v1426_v49 = vadd.f32 %v3369_v17, %v1397_v32  ;;  %v1347_v23 = vmul.f32 %v3357_v47, %v3324_v52  ;;  %v1348_v16 = vmul.f32 %v3357_v47, %v3330_v60  ;;  %v1400_v56 = vmul.f32 %v3355_v29, %v1346_v41 }
 0x56f   :  { %1361 = vst [vmem:[#allocation16 + $0x48] sm:$0xff] %v1336_v44  ;;  %v3520_v42 = vpack.c.bf16 %v1450_v24, %v1449_v10  ;;  %v1427_v22 = vadd.f32 %v3369_v17, %v1398_v59  ;;  %v1349_v44 = vmul.f32 %v3357_v47, %v3336_v31  ;;  %v1428_v52 = vadd.f32 %v3369_v17, %v1399_v50 }
 0x570   :  { %1468 = vst [vmem:[#allocation17 + $0x40] sm:$0xff] %v1443_v7  ;;  %v1451_v30 = vmax.f32 %v1426_v49, 0.0  ;;  %v1401_v60 = vmul.f32 %v3355_v29, %v1347_v23  ;;  %v1402_v5 = vmul.f32 %v3355_v29, %v1348_v16  ;;  %v1429_v36 = vadd.f32 %v3369_v17, %v1400_v56 }
 0x571   :  { %1469 = vst [vmem:[#allocation17 + $0x48] sm:$0xff] %v1444_v35  ;;  %v1452_v33 = vmax.f32 %v1427_v22, 0.0  ;;  %v1350_v28 = vmul.f32 %v3357_v47, %v3342_v34  ;;  %v1403_v31 = vmul.f32 %v3355_v29, %v1349_v44  ;;  %v1502_v19 = vpack.c.bf16 %v1438_v38, %v1437_v11 }
 0x572   :  { %1362 = vst [vmem:[#allocation16 + $0x50] sm:$0xff] %v3421_v1  ;;  %v1453_v43 = vmax.f32 %v1428_v52, 0.0  ;;  %v1430_v26 = vadd.f32 %v3369_v17, %v1401_v60  ;;  %v1431_v1 = vadd.f32 %v3369_v17, %v1402_v5  ;;  %v1454_v12 = vmax.f32 %v1429_v36, 0.0 }
 0x573   :  { %1363 = vst [vmem:[#allocation16 + $0x58] sm:$0xff] %v3430_v51  ;;  %v1509_v3 = vpack.c.bf16 %v1452_v33, %v1451_v30  ;;  %v1404_v4 = vmul.f32 %v3355_v29, %v1350_v28  ;;  %v1432_v34 = vadd.f32 %v3369_v17, %v1403_v31 }
 0x574   :  { %1470 = vst [vmem:[#allocation17 + $0x50] sm:$0xff] %v1445_v18  ;;  %v1455_v47 = vmax.f32 %v1430_v26, 0.0  ;;  %v1456_v6 = vmax.f32 %v1431_v1, 0.0  ;;  %v1510_v48 = vpack.c.bf16 %v1454_v12, %v1453_v43 }
 0x575   :  { %1579 = vmatmul.bf16.gmra.mxu3 %v1502_v19  ;;  %1471 = vst [vmem:[#allocation17 + $0x58] sm:$0xff] %v1446_v46  ;;  %v1433_v11 = vadd.f32 %v3369_v17, %v1404_v4  ;;  %v1457_v38 = vmax.f32 %v1432_v34, 0.0 }
 0x576   :  { %1364 = vst [vmem:[#allocation16 + $0x60] sm:$0xff] %v3439_v25  ;;  %v1511_v51 = vpack.c.bf16 %v1456_v6, %v1455_v47  ;;  %v1405_v25 = vmul.f32 %v3355_v29, %v3360_v61  ;;  %v1504_v29 = vpack.c.bf16 %v1442_v63, %v1441_v0  ;;  %v1505_v61 = vpack.c.bf16 %v1444_v35, %v1443_v7 }
 0x577   :  { %1365 = vst [vmem:[#allocation16 + $0x68] sm:$0xff] %v3443_v20  ;;  %v1458_v18 = vmax.f32 %v1433_v11, 0.0  ;;  %v1503_v20 = vpack.c.bf16 %v1440_v40, %v1439_v8 }
 0x578   :  { %1472 = vst [vmem:[#allocation17 + $0x60] sm:$0xff] %v1447_v39 }
 0x579   :  { %1473 = vst [vmem:[#allocation17 + $0x68] sm:$0xff] %v1448_v21  ;;  %v1512_v14 = vpack.c.bf16 %v1458_v18, %v1457_v38 }
 0x57a   :  { %1366 = vst [vmem:[#allocation16 + $0x70] sm:$0xff] %v3455_v57  ;;  %v1434_v57 = vadd.f32 %v3369_v17, %v1405_v25  ;;  %v3572_v17 = vld [vmem:[%s3644_s15] ss:$0 sm:$0xff] }
 0x57b   :  { %1367 = vst [vmem:[#allocation16 + $0x78] sm:$0xff] %v3466_v62 }
 0x57c   :  { %1474 = vst [vmem:[#allocation17 + $0x70] sm:$0xff] %v1449_v10  ;;  %v1459_v62 = vmax.f32 %v1434_v57, 0.0 }
 0x57d   :  { %1475 = vst [vmem:[#allocation17 + $0x78] sm:$0xff] %v1450_v24 }
 0x57e   :  { %1368 = vst [vmem:[#allocation16 + $0x80] sm:$0xff] %v3489_v37 }
 0x57f   :  { %1369 = vst [vmem:[#allocation16 + $0x88] sm:$0xff] %v1344_v2  ;;  %v1513_v2 = vpack.c.bf16 %v1459_v62, %v1459_v62 }
 0x580   :  { %1476 = vst [vmem:[#allocation17 + $0x80] sm:$0xff] %v1451_v30 }
 0x581   :  { %1477 = vst [vmem:[#allocation17 + $0x88] sm:$0xff] %v1452_v33 }
 0x582   :  { %1370 = vst [vmem:[#allocation16 + $0x90] sm:$0xff] %v1345_v54 }
 0x583   :  { %1371 = vst [vmem:[#allocation16 + $0x98] sm:$0xff] %v1346_v41 }
 0x584   :  { %1478 = vst [vmem:[#allocation17 + $0x90] sm:$0xff] %v1453_v43 }
 0x585   :  { %1584 = vmatmul.bf16.gmra.mxu3 %v1503_v20  ;;  %1479 = vst [vmem:[#allocation17 + $0x98] sm:$0xff] %v1454_v12 }
 0x586   :  { %1372 = vst [vmem:[#allocation16 + $0xa0] sm:$0xff] %v1347_v23 }
 0x587   :  { %1373 = vst [vmem:[#allocation16 + $0xa8] sm:$0xff] %v1348_v16 }
 0x588   :  { %1480 = vst [vmem:[#allocation17 + $0xa0] sm:$0xff] %v1455_v47 }
 0x589   :  { %1481 = vst [vmem:[#allocation17 + $0xa8] sm:$0xff] %v1456_v6 }
 0x58a   :  { %1374 = vst [vmem:[#allocation16 + $0xb0] sm:$0xff] %v1349_v44 }
 0x58b   :  { %1375 = vst [vmem:[#allocation16 + $0xb8] sm:$0xff] %v1350_v28 }
 0x58c   :  { %1482 = vst [vmem:[#allocation17 + $0xb0] sm:$0xff] %v1457_v38  ;;  %1702 = dma.vmem_to_hbm [thread:$0]  %s1695_s7, 3200, %s1697_s8, [#allocation15], %s3663_s6, %s3663_s6, %s2227_s26  }
 0x58d   :  { %1483 = vst [vmem:[#allocation17 + $0xb8] sm:$0xff] %v1458_v18 }
 0x58e   :  { %1484 = vst [vmem:[#allocation17 + $0xc0] sm:$0xff] %v1459_v62 }
 0x58f   :  { %1715 = dma.vmem_to_hbm [thread:$0]  %s1708_s14, 3200, %s1710_s2, [#allocation18], %s3663_s6, %s3663_s6, %s2227_s26  }
 0x595   :  { %1589 = vmatmul.bf16.gmra.mxu3 %v1504_v29 }
 0x5a5   :  { %1594 = vmatmul.bf16.gmra.mxu3 %v1505_v61 }
 0x5b5   :  { %1599 = vmatmul.bf16.gmra.mxu3 %v3500_v15 }
 0x5c5   :  { %1604 = vmatmul.bf16.gmra.mxu3 %v3507_v45 }
 0x5d5   :  { %1609 = vmatmul.bf16.gmra.mxu3 %v3520_v42 }
 0x5e5   :  { %1614 = vmatmul.bf16.gmra.mxu3 %v1509_v3 }
 0x5e8   :  { %v1575_v58 = vpop.f32.mrf.mxu3 }
 0x5e9   :  { %v1576_v53 = vadd.f32 %v3572_v17, %v1575_v58 }
 0x5eb   :  { %1639 = vst [vmem:[#allocation19] sm:$0xff] %v1576_v53 }
 0x5f0   :  { %v1577_v13 = vpop.f32.mrf.mxu3 }
 0x5f1   :  { %v1578_v8 = vadd.f32 %v3572_v17, %v1577_v13 }
 0x5f3   :  { %1640 = vst [vmem:[#allocation19 + $0x8] sm:$0xff] %v1578_v8 }
 0x5f5   :  { %1619 = vmatmul.bf16.gmra.mxu3 %v1510_v48 }
 0x5f8   :  { %v1580_v27 = vpop.f32.mrf.mxu3 }
 0x5f9   :  { %v1581_v40 = vadd.f32 %v3572_v17, %v1580_v27 }
 0x5fb   :  { %1641 = vst [vmem:[#allocation19 + $0x10] sm:$0xff] %v1581_v40 }
 0x600   :  { %v1582_v0 = vpop.f32.mrf.mxu3 }
 0x601   :  { %v1583_v9 = vadd.f32 %v3572_v17, %v1582_v0 }
 0x603   :  { %1642 = vst [vmem:[#allocation19 + $0x18] sm:$0xff] %v1583_v9 }
 0x605   :  { %1624 = vmatmul.bf16.gmra.mxu3 %v1511_v51 }
 0x608   :  { %v1585_v55 = vpop.f32.mrf.mxu3 }
 0x609   :  { %v1586_v63 = vadd.f32 %v3572_v17, %v1585_v55 }
 0x60b   :  { %1643 = vst [vmem:[#allocation19 + $0x20] sm:$0xff] %v1586_v63 }
 0x610   :  { %v1587_v7 = vpop.f32.mrf.mxu3 }
 0x611   :  { %v1588_v35 = vadd.f32 %v3572_v17, %v1587_v7 }
 0x613   :  { %1644 = vst [vmem:[#allocation19 + $0x28] sm:$0xff] %v1588_v35 }
 0x615   :  { %1629 = vmatmul.bf16.gmra.mxu3 %v1512_v14 }
 0x618   :  { %v1590_v46 = vpop.f32.mrf.mxu3 }
 0x619   :  { %v1591_v37 = vadd.f32 %v3572_v17, %v1590_v46 }
 0x61b   :  { %1645 = vst [vmem:[#allocation19 + $0x30] sm:$0xff] %v1591_v37 }
 0x620   :  { %v1592_v39 = vpop.f32.mrf.mxu3 }
 0x621   :  { %v1593_v21 = vadd.f32 %v3572_v17, %v1592_v39 }
 0x623   :  { %1646 = vst [vmem:[#allocation19 + $0x38] sm:$0xff] %v1593_v21 }
 0x625   :  { %1634 = vmatmul.bf16.gmra.mxu3 %v1513_v2 }
 0x628   :  { %v1595_v15 = vpop.f32.mrf.mxu3 }
 0x629   :  { %v1596_v10 = vadd.f32 %v3572_v17, %v1595_v15 }
 0x62b   :  { %1647 = vst [vmem:[#allocation19 + $0x40] sm:$0xff] %v1596_v10 }
 0x630   :  { %v1597_v32 = vpop.f32.mrf.mxu3 }
 0x631   :  { %v1598_v54 = vadd.f32 %v3572_v17, %v1597_v32 }
 0x633   :  { %1648 = vst [vmem:[#allocation19 + $0x48] sm:$0xff] %v1598_v54 }
 0x638   :  { %v1600_v45 = vpop.f32.mrf.mxu3 }
 0x639   :  { %v1601_v24 = vadd.f32 %v3572_v17, %v1600_v45 }
 0x63b   :  { %1649 = vst [vmem:[#allocation19 + $0x50] sm:$0xff] %v1601_v24 }
 0x640   :  { %v1602_v59 = vpop.f32.mrf.mxu3 }
 0x641   :  { %v1603_v41 = vadd.f32 %v3572_v17, %v1602_v59 }
 0x643   :  { %1650 = vst [vmem:[#allocation19 + $0x58] sm:$0xff] %v1603_v41 }
 0x648   :  { %v1605_v49 = vpop.f32.mrf.mxu3 }
 0x649   :  { %v1606_v50 = vadd.f32 %v3572_v17, %v1605_v49 }
 0x64b   :  { %1651 = vst [vmem:[#allocation19 + $0x60] sm:$0xff] %v1606_v50 }
 0x650   :  { %v1607_v23 = vpop.f32.mrf.mxu3 }
 0x651   :  { %v1608_v16 = vadd.f32 %v3572_v17, %v1607_v23 }
 0x653   :  { %1652 = vst [vmem:[#allocation19 + $0x68] sm:$0xff] %v1608_v16 }
 0x658   :  { %v1610_v42 = vpop.f32.mrf.mxu3 }
 0x659   :  { %v1611_v22 = vadd.f32 %v3572_v17, %v1610_v42 }
 0x65b   :  { %1653 = vst [vmem:[#allocation19 + $0x70] sm:$0xff] %v1611_v22 }
 0x660   :  { %v1612_v56 = vpop.f32.mrf.mxu3 }
 0x661   :  { %v1613_v44 = vadd.f32 %v3572_v17, %v1612_v56 }
 0x663   :  { %1654 = vst [vmem:[#allocation19 + $0x78] sm:$0xff] %v1613_v44 }
 0x668   :  { %v1615_v30 = vpop.f32.mrf.mxu3 }
 0x669   :  { %v1616_v52 = vadd.f32 %v3572_v17, %v1615_v30 }
 0x66b   :  { %1655 = vst [vmem:[#allocation19 + $0x80] sm:$0xff] %v1616_v52 }
 0x670   :  { %v1617_v60 = vpop.f32.mrf.mxu3 }
 0x671   :  { %v1618_v5 = vadd.f32 %v3572_v17, %v1617_v60 }
 0x673   :  { %1656 = vst [vmem:[#allocation19 + $0x88] sm:$0xff] %v1618_v5 }
 0x678   :  { %v1620_v33 = vpop.f32.mrf.mxu3 }
 0x679   :  { %v1621_v36 = vadd.f32 %v3572_v17, %v1620_v33 }
 0x67b   :  { %1657 = vst [vmem:[#allocation19 + $0x90] sm:$0xff] %v1621_v36 }
 0x680   :  { %v1622_v28 = vpop.f32.mrf.mxu3 }
 0x681   :  { %v1623_v31 = vadd.f32 %v3572_v17, %v1622_v28 }
 0x683   :  { %1658 = vst [vmem:[#allocation19 + $0x98] sm:$0xff] %v1623_v31 }
 0x688   :  { %v1625_v19 = vpop.f32.mrf.mxu3 }
 0x689   :  { %v1626_v43 = vadd.f32 %v3572_v17, %v1625_v19 }
 0x68b   :  { %1659 = vst [vmem:[#allocation19 + $0xa0] sm:$0xff] %v1626_v43 }
 0x690   :  { %v1627_v26 = vpop.f32.mrf.mxu3 }
 0x691   :  { %v1628_v1 = vadd.f32 %v3572_v17, %v1627_v26 }
 0x693   :  { %1660 = vst [vmem:[#allocation19 + $0xa8] sm:$0xff] %v1628_v1 }
 0x698   :  { %v1630_v3 = vpop.f32.mrf.mxu3 }
 0x699   :  { %v1631_v12 = vadd.f32 %v3572_v17, %v1630_v3 }
 0x69b   :  { %1661 = vst [vmem:[#allocation19 + $0xb0] sm:$0xff] %v1631_v12 }
 0x6a0   :  { %v1632_v4 = vpop.f32.mrf.mxu3 }
 0x6a1   :  { %v1633_v34 = vadd.f32 %v3572_v17, %v1632_v4 }
 0x6a3   :  { %1662 = vst [vmem:[#allocation19 + $0xb8] sm:$0xff] %v1633_v34 }
 0x6a8   :  { %v1635_v47 = vpop.f32.mrf.mxu3 }
 0x6a9   :  { %v1636_v6 = vadd.f32 %v3572_v17, %v1635_v47 }
 0x6ab   :  { %1663 = vst [vmem:[#allocation19 + $0xc0] sm:$0xff] %v1636_v6 }
 0x6ac   :  { %1728 = dma.vmem_to_hbm [thread:$0]  %s1721_s11, 3200, %s1723_s12, [#allocation18], %s3663_s6, %s3663_s6, %s2227_s26  }
 0x6b0   :  { %v1637_v48 = vpop.f32.mrf.mxu3 }
 0x6b1   :  { %2219 = dma.done.wait [#allocation4], 3200  }
 0x6b2   :  { %2220 = vsyncadd [#allocation4], 4294964096 }
 0x6b3   :  { %2221 = dma.done.wait [#allocation15], 6400  }
 0x6b4   :  { %2222 = vsyncadd [#allocation15], 4294960896 }
 0x6b5   :  { %2223 = dma.done.wait [#allocation18], 6400  }
 0x6b6   :  { %2224 = vsyncadd [#allocation18], 4294960896 }
 0x6b7   :  { %1749 = vsyncpa [#allocation3], 1 }
 0x6b8   :  { %1750 = vsyncpa [#allocation6], 1 }
 0x6b9   :  { %1751 = vsyncpa [#allocation9], 1 }
 0x6ba   :  { %1752 = vsyncpa [#allocation12], 1 }
 0x6bb   :  { %1753 = vsyncpa [#allocation4], 1 }
 0x6bc   :  { %1754 = vsyncpa [#allocation15], 1 }
 0x6bd   :  { %1755 = vsyncpa [#allocation18], 1 }

</bundles_post_ra>
